<compile_context>
chip_gen: v7x
topology: tpu7x:2x2x1
jax: 0.10.0
libtpu: 0.0.40
codegen_flags: <defaults>
</compile_context>

<pallas_src>
import jax
import jax.numpy as jnp
from jax import lax
from jax.experimental import pallas as pl
from jax.experimental.pallas import tpu as pltpu


# ---------------------------------------------------------------------------
# Fused kernel: feature MLP + 2-layer tanh RNN + fc head + mask + log_softmax
# ---------------------------------------------------------------------------
def _fused_kernel(x_ref, hinit_ref, maskb_ref, feat_ref,
                  wih0_ref, whhblk_ref, b0_ref, wih1_ref, b1_ref,
                  fcw_ref, fcb_ref, fe1blk_ref, fe1b_ref, fe2blk_ref,
                  out_ref, hT_ref,
                  xproj_scr, rnn_scr, h0_scr, h1_scr):
    T, BT, H = rnn_scr.shape
    O = out_ref.shape[-1]

    # ---- feature-encoding MLP: two lane-dense block-diagonal MXU matmuls ----
    #   fe[r, o] = fe2_w . relu(fe1_w @ feat[r, o] + fe1_b)   (fe2_b folded
    #   into the fc bias).  bf16 operands, f32 accumulation.
    z = jnp.dot(feat_ref[...], fe1blk_ref[...],
                preferred_element_type=jnp.float32) + fe1b_ref[...]
    z = jnp.maximum(z, 0.0)                                    # (T*BT, O*H) f32
    fe = jnp.dot(z.astype(jnp.bfloat16), fe2blk_ref[...],
                 preferred_element_type=jnp.float32)           # (T*BT, O)

    # ---- layer-0 input projection hoisted out of the recurrence (bf16) ----
    xproj_scr[...] = (jnp.dot(x_ref[...], wih0_ref[...],
                              preferred_element_type=jnp.float32)
                      + b0_ref[...]).reshape(T, BT, H)

    # ---- recurrence: serial over T, state lives in VMEM scratch ----
    # Recurrent matmuls kept f32: bf16 rounding compounds over the serial
    # chain of T dependent steps (per perf-review correctness note).
    # TODO(synk): nn.RNN inter-layer dropout is train-only; eval semantics here.
    whh_blk = whhblk_ref[...]                                  # (2H, 2H) block-diag
    wih1 = wih1_ref[...]
    b1 = b1_ref[...]
    h0_scr[...] = hinit_ref[0]
    h1_scr[...] = hinit_ref[1]

    def step(t, carry):
        h0 = h0_scr[...]
        h1 = h1_scr[...]
        rec = jnp.dot(jnp.concatenate([h0, h1], axis=-1), whh_blk,
                      preferred_element_type=jnp.float32)      # (BT, 2H)
        h0n = jnp.tanh(xproj_scr[t] + rec[:, :H])
        h1n = jnp.tanh(jnp.dot(h0n, wih1, preferred_element_type=jnp.float32)
                       + rec[:, H:] + b1)
        h0_scr[...] = h0n
        h1_scr[...] = h1n
        rnn_scr[t] = h1n
        return carry

    lax.fori_loop(0, T, step, 0, unroll=True)
    hT_ref[0] = h0_scr[...]
    hT_ref[1] = h1_scr[...]

    # ---- fc head + feature encoding + masked_fill + log_softmax ----
    logits = (jnp.dot(rnn_scr[...].reshape(T * BT, H).astype(jnp.bfloat16),
                      fcw_ref[...], preferred_element_type=jnp.float32)
              + fcb_ref[...] + fe)
    # maskb is 0 (keep) / -10000 (masked); keep exact masked_fill semantics.
    logits = jnp.where(maskb_ref[...] == 0.0, logits, maskb_ref[...])
    m = jnp.max(logits, axis=-1, keepdims=True)
    s = logits - m
    out_ref[...] = s - jnp.log(jnp.sum(jnp.exp(s), axis=-1, keepdims=True))


# ---------------------------------------------------------------------------
# One-time parameter preparation (done at init / param-update time, NOT per
# forward call): transposes, bias sums, block-diagonal recurrent weight,
# block-diagonal feature-MLP weights, bf16 casts for the non-recurrent paths.
# ---------------------------------------------------------------------------
def prepare_params(p):
    H = p["w_hh0"].shape[0]
    O = p["fc_w"].shape[0]
    f32 = jnp.float32
    bf16 = jnp.bfloat16
    zero = jnp.zeros((H, H), f32)
    whh_blk = jnp.block([[p["w_hh0"].T, zero],
                         [zero, p["w_hh1"].T]])                 # (2H, 2H)
    eyeO = jnp.eye(O, dtype=f32)
    return {
        "wih0_t": p["w_ih0"].T.astype(bf16),                    # (Fr, H)
        "whh_blk": whh_blk.astype(f32),                         # (2H, 2H)
        "b0": (p["b_ih0"] + p["b_hh0"])[None, :].astype(f32),   # (1, H)
        "wih1_t": p["w_ih1"].T.astype(f32),                     # (H, H)
        "b1": (p["b_ih1"] + p["b_hh1"])[None, :].astype(f32),   # (1, H)
        "fcw_t": p["fc_w"].T.astype(bf16),                      # (H, O)
        "fcb_eff": (p["fc_b"] + p["fe2_b"][0])[None, :].astype(f32),   # (1, O)
        "fe1_blk": jnp.kron(eyeO, p["fe1_w"].T).astype(bf16),   # (O*F, O*H)
        "fe1b_rep": jnp.tile(p["fe1_b"], O)[None, :].astype(f32),      # (1, O*H)
        "fe2_blk": jnp.kron(eyeO, p["fe2_w"].T).astype(bf16),   # (O*H, O)
    }


# ---------------------------------------------------------------------------
# Wrapper: pad batch to 8-row tiles, time-major flatten per tile, grid over
# batch tiles (parallel), call the fused kernel.
# ---------------------------------------------------------------------------
@jax.jit
def edge_rnn_forward(x, hidden, masks, feature_tensor, q):
    B, T, Fr = x.shape
    O = masks.shape[-1]
    L, _, H = hidden.shape
    F = feature_tensor.shape[-1]
    BT = 8                                   # sequences per grid program (sublane tile)
    Bp = max(BT, ((B + BT - 1) // BT) * BT)
    nbt = Bp // BT
    pb = Bp - B
    f32 = jnp.float32
    bf16 = jnp.bfloat16

    # --- pad batch and lay out per batch-tile, time-major (tiny XLA glue) ---
    x_p = jnp.pad(x.astype(f32), ((0, pb), (0, 0), (0, 0)))
    x_b = (x_p.reshape(nbt, BT, T, Fr).transpose(0, 2, 1, 3)
           .reshape(nbt, T * BT, Fr).astype(bf16))
    h_b = (jnp.pad(hidden.astype(f32), ((0, 0), (0, pb), (0, 0)))
           .reshape(L, nbt, BT, H).transpose(1, 0, 2, 3))           # (nbt,L,BT,H)
    m_p = jnp.pad(masks, ((0, pb), (0, 0), (0, 0)))
    maskb = jnp.where(m_p, jnp.float32(0.0), jnp.float32(-10000.0))
    maskb_b = (maskb.reshape(nbt, BT, T, O).transpose(0, 2, 1, 3)
               .reshape(nbt, T * BT, O))
    f_p = jnp.pad(feature_tensor.astype(f32), ((0, pb), (0, 0), (0, 0), (0, 0)))
    f_b = (f_p.reshape(nbt, BT, T, O, F).transpose(0, 2, 1, 3, 4)
           .reshape(nbt, T * BT, O * F).astype(bf16))                # lane dense

    def batch_spec(*tail):
        nd = len(tail)
        return pl.BlockSpec((None,) + tail, lambda i, _nd=nd: (i,) + (0,) * _nd)

    def const_spec(shape):
        nd = len(shape)
        return pl.BlockSpec(tuple(shape), lambda i, _nd=nd: (0,) * _nd)

    out_b, hT_b = pl.pallas_call(
        _fused_kernel,
        grid=(nbt,),
        out_shape=(jax.ShapeDtypeStruct((nbt, T * BT, O), f32),
                   jax.ShapeDtypeStruct((nbt, L, BT, H), f32)),
        in_specs=[
            batch_spec(T * BT, Fr),        # x
            batch_spec(L, BT, H),          # initial hidden
            batch_spec(T * BT, O),         # mask bias
            batch_spec(T * BT, O * F),     # features
            const_spec((Fr, H)),           # wih0_t (bf16)
            const_spec((2 * H, 2 * H)),    # whh_blk (f32)
            const_spec((1, H)),            # b0
            const_spec((H, H)),            # wih1_t (f32)
            const_spec((1, H)),            # b1
            const_spec((H, O)),            # fcw_t (bf16)
            const_spec((1, O)),            # fcb_eff
            const_spec((O * F, O * H)),    # fe1_blk (bf16)
            const_spec((1, O * H)),        # fe1b_rep
            const_spec((O * H, O)),        # fe2_blk (bf16)
        ],
        out_specs=(batch_spec(T * BT, O), batch_spec(L, BT, H)),
        scratch_shapes=[pltpu.VMEM((T, BT, H), f32),   # xproj
                        pltpu.VMEM((T, BT, H), f32),   # rnn outputs (layer 1)
                        pltpu.VMEM((BT, H), f32),      # h0 state
                        pltpu.VMEM((BT, H), f32)],     # h1 state
        compiler_params=pltpu.CompilerParams(
            dimension_semantics=("parallel",),
            vmem_limit_bytes=32 * 1024 * 1024),
    )(x_b, h_b, maskb_b, f_b,
      q["wih0_t"], q["whh_blk"], q["b0"], q["wih1_t"], q["b1"],
      q["fcw_t"], q["fcb_eff"], q["fe1_blk"], q["fe1b_rep"], q["fe2_blk"])

    out = (out_b.reshape(nbt, T, BT, O).transpose(0, 2, 1, 3)
           .reshape(Bp, T, O)[:B])                                   # (B, T, O)
    hT = hT_b.transpose(1, 0, 2, 3).reshape(L, Bp, H)[:, :B]         # (L, B, H)
    return out, hT


# ---------------------------------------------------------------------------
# Deterministic parameter init (PyTorch weight-shape conventions)
# ---------------------------------------------------------------------------
def init_params(key, Fr, F, H, O):
    ks = jax.random.split(key, 14)
    scale = 1.0 / (H ** 0.5)

    def u(k, shape):
        return jax.random.uniform(k, shape, jnp.float32, -scale, scale)

    return {
        "w_ih0": u(ks[0], (H, Fr)), "w_hh0": u(ks[1], (H, H)),
        "b_ih0": u(ks[2], (H,)),    "b_hh0": u(ks[3], (H,)),
        "w_ih1": u(ks[4], (H, H)),  "w_hh1": u(ks[5], (H, H)),
        "b_ih1": u(ks[6], (H,)),    "b_hh1": u(ks[7], (H,)),
        "fc_w": u(ks[8], (O, H)),   "fc_b": u(ks[9], (O,)),
        "fe1_w": u(ks[10], (H, F)), "fe1_b": u(ks[11], (H,)),
        "fe2_w": u(ks[12], (1, H)), "fe2_b": u(ks[13], (1,)),
    }


# ---------------------------------------------------------------------------
# Pure-JAX f32 reference (mirrors the PyTorch forward) for validation
# ---------------------------------------------------------------------------
def reference(x, hidden, masks, feature_tensor, p):
    fe = jax.nn.relu(feature_tensor @ p["fe1_w"].T + p["fe1_b"])
    fe = (fe @ p["fe2_w"].T + p["fe2_b"])[..., 0]
    B, T, _ = x.shape
    h0, h1 = hidden[0], hidden[1]
    outs = []
    for t in range(T):
        xt = x[:, t, :]
        h0 = jnp.tanh(xt @ p["w_ih0"].T + p["b_ih0"] + h0 @ p["w_hh0"].T + p["b_hh0"])
        h1 = jnp.tanh(h0 @ p["w_ih1"].T + p["b_ih1"] + h1 @ p["w_hh1"].T + p["b_hh1"])
        outs.append(h1)
    rnn_out = jnp.stack(outs, axis=1)                       # (B, T, H)
    out = rnn_out @ p["fc_w"].T + p["fc_b"] + fe
    out = jnp.where(masks, out, jnp.float32(-10000.0))
    out = jax.nn.log_softmax(out, axis=-1)
    return out, jnp.stack([h0, h1], axis=0)


if __name__ == "__main__":
    B, T = 2, 8
    Fr, F = 8, 8          # num_edge_features_rnn, num_edge_features
    H, O, L = 32, 16, 2   # hidden_size, output_size, num_layers

    key = jax.random.PRNGKey(0)
    kx, kf, km, kp = jax.random.split(key, 4)
    x = jax.random.normal(kx, (B, T, Fr), jnp.float32)
    feature_tensor = jax.random.normal(kf, (B, T, O, F), jnp.float32)
    masks = jax.random.uniform(km, (B, T, O)) > 0.2
    hidden = jnp.zeros((L, B, H), jnp.float32)              # init_hidden()
    params = init_params(kp, Fr, F, H, O)

    prepped = prepare_params(params)                         # one-time, off the hot path
    out, hT = edge_rnn_forward(x, hidden, masks, feature_tensor, prepped)
    jax.block_until_ready((out, hT))

    # bf16 MXU operands on the non-recurrent matmuls introduce ~1e-2-level
    # deviations vs. the pure-f32 reference; recurrence stays f32.
    ref_out, ref_hT = reference(x, hidden, masks, feature_tensor, params)
    assert jnp.allclose(out, ref_out, atol=5e-2, rtol=1e-3), "output mismatch"
    assert jnp.allclose(hT, ref_hT, atol=5e-2, rtol=1e-3), "hidden mismatch"
    print("KERNEL_OK")
</pallas_src>

<mosaic_0001>
module attributes {stable_mosaic.version = 11 : i64} {
  func.func @_fused_kernel(%arg0: i32, %arg1: memref<1x64x8xbf16, #tpu.memory_space<vmem>>, %arg2: memref<1x2x8x32xf32, #tpu.memory_space<vmem>>, %arg3: memref<1x64x16xf32, #tpu.memory_space<vmem>>, %arg4: memref<1x64x128xbf16, #tpu.memory_space<vmem>>, %arg5: memref<8x32xbf16, #tpu.memory_space<vmem>>, %arg6: memref<64x64xf32, #tpu.memory_space<vmem>>, %arg7: memref<1x32xf32, #tpu.memory_space<vmem>>, %arg8: memref<32x32xf32, #tpu.memory_space<vmem>>, %arg9: memref<1x32xf32, #tpu.memory_space<vmem>>, %arg10: memref<32x16xbf16, #tpu.memory_space<vmem>>, %arg11: memref<1x16xf32, #tpu.memory_space<vmem>>, %arg12: memref<128x512xbf16, #tpu.memory_space<vmem>>, %arg13: memref<1x512xf32, #tpu.memory_space<vmem>>, %arg14: memref<512x16xbf16, #tpu.memory_space<vmem>>, %arg15: memref<1x64x16xf32, #tpu.memory_space<vmem>>, %arg16: memref<1x2x8x32xf32, #tpu.memory_space<vmem>>, %arg17: memref<8x8x32xf32, #tpu.memory_space<vmem>>, %arg18: memref<8x8x32xf32, #tpu.memory_space<vmem>>, %arg19: memref<8x32xf32, #tpu.memory_space<vmem>>, %arg20: memref<8x32xf32, #tpu.memory_space<vmem>>) attributes {dimension_semantics = [#tpu.dimension_semantics<parallel>], iteration_bounds = array<i64: 1>, scalar_prefetch = 0 : i64, scratch_operands = 4 : i64, tpu.core_type = #tpu.core_type<tc>, window_params = [{transform_indices = @transform_0, window_bounds = array<i64: 1, 64, 8>}, {transform_indices = @transform_1, window_bounds = array<i64: 1, 2, 8, 32>}, {transform_indices = @transform_2, window_bounds = array<i64: 1, 64, 16>}, {transform_indices = @transform_3, window_bounds = array<i64: 1, 64, 128>}, {pipeline_mode = #tpu.pipeline_mode<synchronous>, transform_indices = @transform_4, window_bounds = array<i64: 8, 32>}, {pipeline_mode = #tpu.pipeline_mode<synchronous>, transform_indices = @transform_5, window_bounds = array<i64: 64, 64>}, {pipeline_mode = #tpu.pipeline_mode<synchronous>, transform_indices = @transform_6, window_bounds = array<i64: 1, 32>}, {pipeline_mode = #tpu.pipeline_mode<synchronous>, transform_indices = @transform_7, window_bounds = array<i64: 32, 32>}, {pipeline_mode = #tpu.pipeline_mode<synchronous>, transform_indices = @transform_8, window_bounds = array<i64: 1, 32>}, {pipeline_mode = #tpu.pipeline_mode<synchronous>, transform_indices = @transform_9, window_bounds = array<i64: 32, 16>}, {pipeline_mode = #tpu.pipeline_mode<synchronous>, transform_indices = @transform_10, window_bounds = array<i64: 1, 16>}, {pipeline_mode = #tpu.pipeline_mode<synchronous>, transform_indices = @transform_11, window_bounds = array<i64: 128, 512>}, {pipeline_mode = #tpu.pipeline_mode<synchronous>, transform_indices = @transform_12, window_bounds = array<i64: 1, 512>}, {pipeline_mode = #tpu.pipeline_mode<synchronous>, transform_indices = @transform_13, window_bounds = array<i64: 512, 16>}, {transform_indices = @transform_14, window_bounds = array<i64: 1, 64, 16>}, {transform_indices = @transform_15, window_bounds = array<i64: 1, 2, 8, 32>}]} {
    %c0 = arith.constant 0 : index
    %c0_0 = arith.constant 0 : index
    %c0_1 = arith.constant 0 : index
    %0 = vector.load %arg4[%c0, %c0_0, %c0_1] : memref<1x64x128xbf16, #tpu.memory_space<vmem>>, vector<1x64x128xbf16>
    %1 = vector.shape_cast %0 : vector<1x64x128xbf16> to vector<64x128xbf16>
    %c0_2 = arith.constant 0 : index
    %c0_3 = arith.constant 0 : index
    %2 = vector.load %arg12[%c0_2, %c0_3] : memref<128x512xbf16, #tpu.memory_space<vmem>>, vector<128x512xbf16>
    %cst = arith.constant dense<0.000000e+00> : vector<64x512xf32>
    %3 = tpu.matmul %1, %2, %cst {dimension_numbers = #tpu.dot_dimension_numbers<[1], [0], [0], [1], [0, 0, 1, 1], [], []>} : vector<64x128xbf16>, vector<128x512xbf16>, vector<64x512xf32> -> vector<64x512xf32>
    %c0_4 = arith.constant 0 : index
    %c0_5 = arith.constant 0 : index
    %4 = vector.load %arg13[%c0_4, %c0_5] : memref<1x512xf32, #tpu.memory_space<vmem>>, vector<1x512xf32>
    %5 = vector.broadcast %4 : vector<1x512xf32> to vector<64x512xf32>
    %6 = arith.addf %3, %5 : vector<64x512xf32>
    %cst_6 = arith.constant 0.000000e+00 : f32
    %7 = vector.broadcast %cst_6 : f32 to vector<64x512xf32>
    %8 = arith.maximumf %6, %7 : vector<64x512xf32>
    %9 = arith.truncf %8 : vector<64x512xf32> to vector<64x512xbf16>
    %c0_7 = arith.constant 0 : index
    %c0_8 = arith.constant 0 : index
    %10 = vector.load %arg14[%c0_7, %c0_8] : memref<512x16xbf16, #tpu.memory_space<vmem>>, vector<512x16xbf16>
    %cst_9 = arith.constant dense<0.000000e+00> : vector<64x16xf32>
    %11 = tpu.matmul %9, %10, %cst_9 {dimension_numbers = #tpu.dot_dimension_numbers<[1], [0], [0], [1], [0, 0, 1, 1], [], []>} : vector<64x512xbf16>, vector<512x16xbf16>, vector<64x16xf32> -> vector<64x16xf32>
    %c0_10 = arith.constant 0 : index
    %c0_11 = arith.constant 0 : index
    %c0_12 = arith.constant 0 : index
    %12 = vector.load %arg1[%c0_10, %c0_11, %c0_12] : memref<1x64x8xbf16, #tpu.memory_space<vmem>>, vector<1x64x8xbf16>
    %13 = vector.shape_cast %12 : vector<1x64x8xbf16> to vector<64x8xbf16>
    %c0_13 = arith.constant 0 : index
    %c0_14 = arith.constant 0 : index
    %14 = vector.load %arg5[%c0_13, %c0_14] : memref<8x32xbf16, #tpu.memory_space<vmem>>, vector<8x32xbf16>
    %cst_15 = arith.constant dense<0.000000e+00> : vector<64x32xf32>
    %15 = tpu.matmul %13, %14, %cst_15 {dimension_numbers = #tpu.dot_dimension_numbers<[1], [0], [0], [1], [0, 0, 1, 1], [], []>} : vector<64x8xbf16>, vector<8x32xbf16>, vector<64x32xf32> -> vector<64x32xf32>
    %c0_16 = arith.constant 0 : index
    %c0_17 = arith.constant 0 : index
    %16 = vector.load %arg7[%c0_16, %c0_17] : memref<1x32xf32, #tpu.memory_space<vmem>>, vector<1x32xf32>
    %17 = vector.broadcast %16 : vector<1x32xf32> to vector<64x32xf32>
    %18 = arith.addf %15, %17 : vector<64x32xf32>
    %19 = vector.shape_cast %18 : vector<64x32xf32> to vector<8x8x32xf32>
    %c0_18 = arith.constant 0 : index
    %c0_19 = arith.constant 0 : index
    %c0_20 = arith.constant 0 : index
    %20 = vector.load %arg17[%c0_18, %c0_19, %c0_20] : memref<8x8x32xf32, #tpu.memory_space<vmem>>, vector<8x8x32xf32>
    tpu.vector_store %arg17[%c0_18, %c0_19, %c0_20], %19 {strides = array<i32>} : memref<8x8x32xf32, #tpu.memory_space<vmem>>, vector<8x8x32xf32>,
    %c0_21 = arith.constant 0 : index
    %c0_22 = arith.constant 0 : index
    %21 = vector.load %arg6[%c0_21, %c0_22] : memref<64x64xf32, #tpu.memory_space<vmem>>, vector<64x64xf32>
    %c0_23 = arith.constant 0 : index
    %c0_24 = arith.constant 0 : index
    %22 = vector.load %arg8[%c0_23, %c0_24] : memref<32x32xf32, #tpu.memory_space<vmem>>, vector<32x32xf32>
    %c0_25 = arith.constant 0 : index
    %c0_26 = arith.constant 0 : index
    %23 = vector.load %arg9[%c0_25, %c0_26] : memref<1x32xf32, #tpu.memory_space<vmem>>, vector<1x32xf32>
    %c0_27 = arith.constant 0 : index
    %c0_28 = arith.constant 0 : index
    %c0_29 = arith.constant 0 : index
    %c0_30 = arith.constant 0 : index
    %24 = vector.load %arg2[%c0_27, %c0_28, %c0_29, %c0_30] : memref<1x2x8x32xf32, #tpu.memory_space<vmem>>, vector<1x1x8x32xf32>
    %25 = vector.shape_cast %24 : vector<1x1x8x32xf32> to vector<8x32xf32>
    %c0_31 = arith.constant 0 : index
    %c0_32 = arith.constant 0 : index
    %26 = vector.load %arg19[%c0_31, %c0_32] : memref<8x32xf32, #tpu.memory_space<vmem>>, vector<8x32xf32>
    tpu.vector_store %arg19[%c0_31, %c0_32], %25 {strides = array<i32>} : memref<8x32xf32, #tpu.memory_space<vmem>>, vector<8x32xf32>,
    %c0_33 = arith.constant 0 : index
    %c1 = arith.constant 1 : index
    %c0_34 = arith.constant 0 : index
    %c0_35 = arith.constant 0 : index
    %27 = vector.load %arg2[%c0_33, %c1, %c0_34, %c0_35] : memref<1x2x8x32xf32, #tpu.memory_space<vmem>>, vector<1x1x8x32xf32>
    %28 = vector.shape_cast %27 : vector<1x1x8x32xf32> to vector<8x32xf32>
    %c0_36 = arith.constant 0 : index
    %c0_37 = arith.constant 0 : index
    %29 = vector.load %arg20[%c0_36, %c0_37] : memref<8x32xf32, #tpu.memory_space<vmem>>, vector<8x32xf32>
    tpu.vector_store %arg20[%c0_36, %c0_37], %28 {strides = array<i32>} : memref<8x32xf32, #tpu.memory_space<vmem>>, vector<8x32xf32>,
    %c0_i32 = arith.constant 0 : i32
    %c0_38 = arith.constant 0 : index
    %c0_39 = arith.constant 0 : index
    %30 = vector.load %arg19[%c0_38, %c0_39] : memref<8x32xf32, #tpu.memory_space<vmem>>, vector<8x32xf32>
    %c0_40 = arith.constant 0 : index
    %c0_41 = arith.constant 0 : index
    %31 = vector.load %arg20[%c0_40, %c0_41] : memref<8x32xf32, #tpu.memory_space<vmem>>, vector<8x32xf32>
    %32 = tpu.concatenate %30, %31 in 1 : vector<8x32xf32>, vector<8x32xf32> -> vector<8x64xf32>
    %cst_42 = arith.constant dense<0.000000e+00> : vector<8x64xf32>
    %33 = tpu.matmul %32, %21, %cst_42 {dimension_numbers = #tpu.dot_dimension_numbers<[1], [0], [0], [1], [0, 0, 1, 1], [], []>} : vector<8x64xf32>, vector<64x64xf32>, vector<8x64xf32> -> vector<8x64xf32>
    %34 = arith.index_cast %c0_i32 : i32 to index
    %c0_43 = arith.constant 0 : index
    %c0_44 = arith.constant 0 : index
    %35 = vector.load %arg17[%34, %c0_43, %c0_44] : memref<8x8x32xf32, #tpu.memory_space<vmem>>, vector<1x8x32xf32>
    %36 = vector.shape_cast %35 : vector<1x8x32xf32> to vector<8x32xf32>
    %37 = vector.extract_strided_slice %33 {offsets = [0, 0], sizes = [8, 32], strides = [1, 1]} : vector<8x64xf32> to vector<8x32xf32>
    %38 = arith.addf %36, %37 : vector<8x32xf32>
    %39 = math.tanh %38 : vector<8x32xf32>
    %cst_45 = arith.constant dense<0.000000e+00> : vector<8x32xf32>
    %40 = tpu.matmul %39, %22, %cst_45 {dimension_numbers = #tpu.dot_dimension_numbers<[1], [0], [0], [1], [0, 0, 1, 1], [], []>} : vector<8x32xf32>, vector<32x32xf32>, vector<8x32xf32> -> vector<8x32xf32>
    %41 = vector.extract_strided_slice %33 {offsets = [0, 32], sizes = [8, 32], strides = [1, 1]} : vector<8x64xf32> to vector<8x32xf32>
    %42 = arith.addf %40, %41 : vector<8x32xf32>
    %43 = vector.broadcast %23 : vector<1x32xf32> to vector<8x32xf32>
    %44 = arith.addf %42, %43 : vector<8x32xf32>
    %45 = math.tanh %44 : vector<8x32xf32>
    %c0_46 = arith.constant 0 : index
    %c0_47 = arith.constant 0 : index
    %46 = vector.load %arg19[%c0_46, %c0_47] : memref<8x32xf32, #tpu.memory_space<vmem>>, vector<8x32xf32>
    tpu.vector_store %arg19[%c0_46, %c0_47], %39 {strides = array<i32>} : memref<8x32xf32, #tpu.memory_space<vmem>>, vector<8x32xf32>,
    %c0_48 = arith.constant 0 : index
    %c0_49 = arith.constant 0 : index
    %47 = vector.load %arg20[%c0_48, %c0_49] : memref<8x32xf32, #tpu.memory_space<vmem>>, vector<8x32xf32>
    tpu.vector_store %arg20[%c0_48, %c0_49], %45 {strides = array<i32>} : memref<8x32xf32, #tpu.memory_space<vmem>>, vector<8x32xf32>,
    %48 = arith.index_cast %c0_i32 : i32 to index
    %c0_50 = arith.constant 0 : index
    %c0_51 = arith.constant 0 : index
    %49 = vector.load %arg18[%48, %c0_50, %c0_51] : memref<8x8x32xf32, #tpu.memory_space<vmem>>, vector<1x8x32xf32>
    %50 = vector.shape_cast %49 : vector<1x8x32xf32> to vector<8x32xf32>
    %51 = vector.shape_cast %45 : vector<8x32xf32> to vector<1x8x32xf32>
    tpu.vector_store %arg18[%48, %c0_50, %c0_51], %51 {strides = array<i32>} : memref<8x8x32xf32, #tpu.memory_space<vmem>>, vector<1x8x32xf32>,
    %c1_i32 = arith.constant 1 : i32
    %c0_52 = arith.constant 0 : index
    %c0_53 = arith.constant 0 : index
    %52 = vector.load %arg19[%c0_52, %c0_53] : memref<8x32xf32, #tpu.memory_space<vmem>>, vector<8x32xf32>
    %c0_54 = arith.constant 0 : index
    %c0_55 = arith.constant 0 : index
    %53 = vector.load %arg20[%c0_54, %c0_55] : memref<8x32xf32, #tpu.memory_space<vmem>>, vector<8x32xf32>
    %54 = tpu.concatenate %52, %53 in 1 : vector<8x32xf32>, vector<8x32xf32> -> vector<8x64xf32>
    %cst_56 = arith.constant dense<0.000000e+00> : vector<8x64xf32>
    %55 = tpu.matmul %54, %21, %cst_56 {dimension_numbers = #tpu.dot_dimension_numbers<[1], [0], [0], [1], [0, 0, 1, 1], [], []>} : vector<8x64xf32>, vector<64x64xf32>, vector<8x64xf32> -> vector<8x64xf32>
    %56 = arith.index_cast %c1_i32 : i32 to index
    %c0_57 = arith.constant 0 : index
    %c0_58 = arith.constant 0 : index
    %57 = vector.load %arg17[%56, %c0_57, %c0_58] : memref<8x8x32xf32, #tpu.memory_space<vmem>>, vector<1x8x32xf32>
    %58 = vector.shape_cast %57 : vector<1x8x32xf32> to vector<8x32xf32>
    %59 = vector.extract_strided_slice %55 {offsets = [0, 0], sizes = [8, 32], strides = [1, 1]} : vector<8x64xf32> to vector<8x32xf32>
    %60 = arith.addf %58, %59 : vector<8x32xf32>
    %61 = math.tanh %60 : vector<8x32xf32>
    %cst_59 = arith.constant dense<0.000000e+00> : vector<8x32xf32>
    %62 = tpu.matmul %61, %22, %cst_59 {dimension_numbers = #tpu.dot_dimension_numbers<[1], [0], [0], [1], [0, 0, 1, 1], [], []>} : vector<8x32xf32>, vector<32x32xf32>, vector<8x32xf32> -> vector<8x32xf32>
    %63 = vector.extract_strided_slice %55 {offsets = [0, 32], sizes = [8, 32], strides = [1, 1]} : vector<8x64xf32> to vector<8x32xf32>
    %64 = arith.addf %62, %63 : vector<8x32xf32>
    %65 = vector.broadcast %23 : vector<1x32xf32> to vector<8x32xf32>
    %66 = arith.addf %64, %65 : vector<8x32xf32>
    %67 = math.tanh %66 : vector<8x32xf32>
    %c0_60 = arith.constant 0 : index
    %c0_61 = arith.constant 0 : index
    %68 = vector.load %arg19[%c0_60, %c0_61] : memref<8x32xf32, #tpu.memory_space<vmem>>, vector<8x32xf32>
    tpu.vector_store %arg19[%c0_60, %c0_61], %61 {strides = array<i32>} : memref<8x32xf32, #tpu.memory_space<vmem>>, vector<8x32xf32>,
    %c0_62 = arith.constant 0 : index
    %c0_63 = arith.constant 0 : index
    %69 = vector.load %arg20[%c0_62, %c0_63] : memref<8x32xf32, #tpu.memory_space<vmem>>, vector<8x32xf32>
    tpu.vector_store %arg20[%c0_62, %c0_63], %67 {strides = array<i32>} : memref<8x32xf32, #tpu.memory_space<vmem>>, vector<8x32xf32>,
    %70 = arith.index_cast %c1_i32 : i32 to index
    %c0_64 = arith.constant 0 : index
    %c0_65 = arith.constant 0 : index
    %71 = vector.load %arg18[%70, %c0_64, %c0_65] : memref<8x8x32xf32, #tpu.memory_space<vmem>>, vector<1x8x32xf32>
    %72 = vector.shape_cast %71 : vector<1x8x32xf32> to vector<8x32xf32>
    %73 = vector.shape_cast %67 : vector<8x32xf32> to vector<1x8x32xf32>
    tpu.vector_store %arg18[%70, %c0_64, %c0_65], %73 {strides = array<i32>} : memref<8x8x32xf32, #tpu.memory_space<vmem>>, vector<1x8x32xf32>,
    %c2_i32 = arith.constant 2 : i32
    %c0_66 = arith.constant 0 : index
    %c0_67 = arith.constant 0 : index
    %74 = vector.load %arg19[%c0_66, %c0_67] : memref<8x32xf32, #tpu.memory_space<vmem>>, vector<8x32xf32>
    %c0_68 = arith.constant 0 : index
    %c0_69 = arith.constant 0 : index
    %75 = vector.load %arg20[%c0_68, %c0_69] : memref<8x32xf32, #tpu.memory_space<vmem>>, vector<8x32xf32>
    %76 = tpu.concatenate %74, %75 in 1 : vector<8x32xf32>, vector<8x32xf32> -> vector<8x64xf32>
    %cst_70 = arith.constant dense<0.000000e+00> : vector<8x64xf32>
    %77 = tpu.matmul %76, %21, %cst_70 {dimension_numbers = #tpu.dot_dimension_numbers<[1], [0], [0], [1], [0, 0, 1, 1], [], []>} : vector<8x64xf32>, vector<64x64xf32>, vector<8x64xf32> -> vector<8x64xf32>
    %78 = arith.index_cast %c2_i32 : i32 to index
    %c0_71 = arith.constant 0 : index
    %c0_72 = arith.constant 0 : index
    %79 = vector.load %arg17[%78, %c0_71, %c0_72] : memref<8x8x32xf32, #tpu.memory_space<vmem>>, vector<1x8x32xf32>
    %80 = vector.shape_cast %79 : vector<1x8x32xf32> to vector<8x32xf32>
    %81 = vector.extract_strided_slice %77 {offsets = [0, 0], sizes = [8, 32], strides = [1, 1]} : vector<8x64xf32> to vector<8x32xf32>
    %82 = arith.addf %80, %81 : vector<8x32xf32>
    %83 = math.tanh %82 : vector<8x32xf32>
    %cst_73 = arith.constant dense<0.000000e+00> : vector<8x32xf32>
    %84 = tpu.matmul %83, %22, %cst_73 {dimension_numbers = #tpu.dot_dimension_numbers<[1], [0], [0], [1], [0, 0, 1, 1], [], []>} : vector<8x32xf32>, vector<32x32xf32>, vector<8x32xf32> -> vector<8x32xf32>
    %85 = vector.extract_strided_slice %77 {offsets = [0, 32], sizes = [8, 32], strides = [1, 1]} : vector<8x64xf32> to vector<8x32xf32>
    %86 = arith.addf %84, %85 : vector<8x32xf32>
    %87 = vector.broadcast %23 : vector<1x32xf32> to vector<8x32xf32>
    %88 = arith.addf %86, %87 : vector<8x32xf32>
    %89 = math.tanh %88 : vector<8x32xf32>
    %c0_74 = arith.constant 0 : index
    %c0_75 = arith.constant 0 : index
    %90 = vector.load %arg19[%c0_74, %c0_75] : memref<8x32xf32, #tpu.memory_space<vmem>>, vector<8x32xf32>
    tpu.vector_store %arg19[%c0_74, %c0_75], %83 {strides = array<i32>} : memref<8x32xf32, #tpu.memory_space<vmem>>, vector<8x32xf32>,
    %c0_76 = arith.constant 0 : index
    %c0_77 = arith.constant 0 : index
    %91 = vector.load %arg20[%c0_76, %c0_77] : memref<8x32xf32, #tpu.memory_space<vmem>>, vector<8x32xf32>
    tpu.vector_store %arg20[%c0_76, %c0_77], %89 {strides = array<i32>} : memref<8x32xf32, #tpu.memory_space<vmem>>, vector<8x32xf32>,
    %92 = arith.index_cast %c2_i32 : i32 to index
    %c0_78 = arith.constant 0 : index
    %c0_79 = arith.constant 0 : index
    %93 = vector.load %arg18[%92, %c0_78, %c0_79] : memref<8x8x32xf32, #tpu.memory_space<vmem>>, vector<1x8x32xf32>
    %94 = vector.shape_cast %93 : vector<1x8x32xf32> to vector<8x32xf32>
    %95 = vector.shape_cast %89 : vector<8x32xf32> to vector<1x8x32xf32>
    tpu.vector_store %arg18[%92, %c0_78, %c0_79], %95 {strides = array<i32>} : memref<8x8x32xf32, #tpu.memory_space<vmem>>, vector<1x8x32xf32>,
    %c3_i32 = arith.constant 3 : i32
    %c0_80 = arith.constant 0 : index
    %c0_81 = arith.constant 0 : index
    %96 = vector.load %arg19[%c0_80, %c0_81] : memref<8x32xf32, #tpu.memory_space<vmem>>, vector<8x32xf32>
    %c0_82 = arith.constant 0 : index
    %c0_83 = arith.constant 0 : index
    %97 = vector.load %arg20[%c0_82, %c0_83] : memref<8x32xf32, #tpu.memory_space<vmem>>, vector<8x32xf32>
    %98 = tpu.concatenate %96, %97 in 1 : vector<8x32xf32>, vector<8x32xf32> -> vector<8x64xf32>
    %cst_84 = arith.constant dense<0.000000e+00> : vector<8x64xf32>
    %99 = tpu.matmul %98, %21, %cst_84 {dimension_numbers = #tpu.dot_dimension_numbers<[1], [0], [0], [1], [0, 0, 1, 1], [], []>} : vector<8x64xf32>, vector<64x64xf32>, vector<8x64xf32> -> vector<8x64xf32>
    %100 = arith.index_cast %c3_i32 : i32 to index
    %c0_85 = arith.constant 0 : index
    %c0_86 = arith.constant 0 : index
    %101 = vector.load %arg17[%100, %c0_85, %c0_86] : memref<8x8x32xf32, #tpu.memory_space<vmem>>, vector<1x8x32xf32>
    %102 = vector.shape_cast %101 : vector<1x8x32xf32> to vector<8x32xf32>
    %103 = vector.extract_strided_slice %99 {offsets = [0, 0], sizes = [8, 32], strides = [1, 1]} : vector<8x64xf32> to vector<8x32xf32>
    %104 = arith.addf %102, %103 : vector<8x32xf32>
    %105 = math.tanh %104 : vector<8x32xf32>
    %cst_87 = arith.constant dense<0.000000e+00> : vector<8x32xf32>
    %106 = tpu.matmul %105, %22, %cst_87 {dimension_numbers = #tpu.dot_dimension_numbers<[1], [0], [0], [1], [0, 0, 1, 1], [], []>} : vector<8x32xf32>, vector<32x32xf32>, vector<8x32xf32> -> vector<8x32xf32>
    %107 = vector.extract_strided_slice %99 {offsets = [0, 32], sizes = [8, 32], strides = [1, 1]} : vector<8x64xf32> to vector<8x32xf32>
    %108 = arith.addf %106, %107 : vector<8x32xf32>
    %109 = vector.broadcast %23 : vector<1x32xf32> to vector<8x32xf32>
    %110 = arith.addf %108, %109 : vector<8x32xf32>
    %111 = math.tanh %110 : vector<8x32xf32>
    %c0_88 = arith.constant 0 : index
    %c0_89 = arith.constant 0 : index
    %112 = vector.load %arg19[%c0_88, %c0_89] : memref<8x32xf32, #tpu.memory_space<vmem>>, vector<8x32xf32>
    tpu.vector_store %arg19[%c0_88, %c0_89], %105 {strides = array<i32>} : memref<8x32xf32, #tpu.memory_space<vmem>>, vector<8x32xf32>,
    %c0_90 = arith.constant 0 : index
    %c0_91 = arith.constant 0 : index
    %113 = vector.load %arg20[%c0_90, %c0_91] : memref<8x32xf32, #tpu.memory_space<vmem>>, vector<8x32xf32>
    tpu.vector_store %arg20[%c0_90, %c0_91], %111 {strides = array<i32>} : memref<8x32xf32, #tpu.memory_space<vmem>>, vector<8x32xf32>,
    %114 = arith.index_cast %c3_i32 : i32 to index
    %c0_92 = arith.constant 0 : index
    %c0_93 = arith.constant 0 : index
    %115 = vector.load %arg18[%114, %c0_92, %c0_93] : memref<8x8x32xf32, #tpu.memory_space<vmem>>, vector<1x8x32xf32>
    %116 = vector.shape_cast %115 : vector<1x8x32xf32> to vector<8x32xf32>
    %117 = vector.shape_cast %111 : vector<8x32xf32> to vector<1x8x32xf32>
    tpu.vector_store %arg18[%114, %c0_92, %c0_93], %117 {strides = array<i32>} : memref<8x8x32xf32, #tpu.memory_space<vmem>>, vector<1x8x32xf32>,
    %c4_i32 = arith.constant 4 : i32
    %c0_94 = arith.constant 0 : index
    %c0_95 = arith.constant 0 : index
    %118 = vector.load %arg19[%c0_94, %c0_95] : memref<8x32xf32, #tpu.memory_space<vmem>>, vector<8x32xf32>
    %c0_96 = arith.constant 0 : index
    %c0_97 = arith.constant 0 : index
    %119 = vector.load %arg20[%c0_96, %c0_97] : memref<8x32xf32, #tpu.memory_space<vmem>>, vector<8x32xf32>
    %120 = tpu.concatenate %118, %119 in 1 : vector<8x32xf32>, vector<8x32xf32> -> vector<8x64xf32>
    %cst_98 = arith.constant dense<0.000000e+00> : vector<8x64xf32>
    %121 = tpu.matmul %120, %21, %cst_98 {dimension_numbers = #tpu.dot_dimension_numbers<[1], [0], [0], [1], [0, 0, 1, 1], [], []>} : vector<8x64xf32>, vector<64x64xf32>, vector<8x64xf32> -> vector<8x64xf32>
    %122 = arith.index_cast %c4_i32 : i32 to index
    %c0_99 = arith.constant 0 : index
    %c0_100 = arith.constant 0 : index
    %123 = vector.load %arg17[%122, %c0_99, %c0_100] : memref<8x8x32xf32, #tpu.memory_space<vmem>>, vector<1x8x32xf32>
    %124 = vector.shape_cast %123 : vector<1x8x32xf32> to vector<8x32xf32>
    %125 = vector.extract_strided_slice %121 {offsets = [0, 0], sizes = [8, 32], strides = [1, 1]} : vector<8x64xf32> to vector<8x32xf32>
    %126 = arith.addf %124, %125 : vector<8x32xf32>
    %127 = math.tanh %126 : vector<8x32xf32>
    %cst_101 = arith.constant dense<0.000000e+00> : vector<8x32xf32>
    %128 = tpu.matmul %127, %22, %cst_101 {dimension_numbers = #tpu.dot_dimension_numbers<[1], [0], [0], [1], [0, 0, 1, 1], [], []>} : vector<8x32xf32>, vector<32x32xf32>, vector<8x32xf32> -> vector<8x32xf32>
    %129 = vector.extract_strided_slice %121 {offsets = [0, 32], sizes = [8, 32], strides = [1, 1]} : vector<8x64xf32> to vector<8x32xf32>
    %130 = arith.addf %128, %129 : vector<8x32xf32>
    %131 = vector.broadcast %23 : vector<1x32xf32> to vector<8x32xf32>
    %132 = arith.addf %130, %131 : vector<8x32xf32>
    %133 = math.tanh %132 : vector<8x32xf32>
    %c0_102 = arith.constant 0 : index
    %c0_103 = arith.constant 0 : index
    %134 = vector.load %arg19[%c0_102, %c0_103] : memref<8x32xf32, #tpu.memory_space<vmem>>, vector<8x32xf32>
    tpu.vector_store %arg19[%c0_102, %c0_103], %127 {strides = array<i32>} : memref<8x32xf32, #tpu.memory_space<vmem>>, vector<8x32xf32>,
    %c0_104 = arith.constant 0 : index
    %c0_105 = arith.constant 0 : index
    %135 = vector.load %arg20[%c0_104, %c0_105] : memref<8x32xf32, #tpu.memory_space<vmem>>, vector<8x32xf32>
    tpu.vector_store %arg20[%c0_104, %c0_105], %133 {strides = array<i32>} : memref<8x32xf32, #tpu.memory_space<vmem>>, vector<8x32xf32>,
    %136 = arith.index_cast %c4_i32 : i32 to index
    %c0_106 = arith.constant 0 : index
    %c0_107 = arith.constant 0 : index
    %137 = vector.load %arg18[%136, %c0_106, %c0_107] : memref<8x8x32xf32, #tpu.memory_space<vmem>>, vector<1x8x32xf32>
    %138 = vector.shape_cast %137 : vector<1x8x32xf32> to vector<8x32xf32>
    %139 = vector.shape_cast %133 : vector<8x32xf32> to vector<1x8x32xf32>
    tpu.vector_store %arg18[%136, %c0_106, %c0_107], %139 {strides = array<i32>} : memref<8x8x32xf32, #tpu.memory_space<vmem>>, vector<1x8x32xf32>,
    %c5_i32 = arith.constant 5 : i32
    %c0_108 = arith.constant 0 : index
    %c0_109 = arith.constant 0 : index
    %140 = vector.load %arg19[%c0_108, %c0_109] : memref<8x32xf32, #tpu.memory_space<vmem>>, vector<8x32xf32>
    %c0_110 = arith.constant 0 : index
    %c0_111 = arith.constant 0 : index
    %141 = vector.load %arg20[%c0_110, %c0_111] : memref<8x32xf32, #tpu.memory_space<vmem>>, vector<8x32xf32>
    %142 = tpu.concatenate %140, %141 in 1 : vector<8x32xf32>, vector<8x32xf32> -> vector<8x64xf32>
    %cst_112 = arith.constant dense<0.000000e+00> : vector<8x64xf32>
    %143 = tpu.matmul %142, %21, %cst_112 {dimension_numbers = #tpu.dot_dimension_numbers<[1], [0], [0], [1], [0, 0, 1, 1], [], []>} : vector<8x64xf32>, vector<64x64xf32>, vector<8x64xf32> -> vector<8x64xf32>
    %144 = arith.index_cast %c5_i32 : i32 to index
    %c0_113 = arith.constant 0 : index
    %c0_114 = arith.constant 0 : index
    %145 = vector.load %arg17[%144, %c0_113, %c0_114] : memref<8x8x32xf32, #tpu.memory_space<vmem>>, vector<1x8x32xf32>
    %146 = vector.shape_cast %145 : vector<1x8x32xf32> to vector<8x32xf32>
    %147 = vector.extract_strided_slice %143 {offsets = [0, 0], sizes = [8, 32], strides = [1, 1]} : vector<8x64xf32> to vector<8x32xf32>
    %148 = arith.addf %146, %147 : vector<8x32xf32>
    %149 = math.tanh %148 : vector<8x32xf32>
    %cst_115 = arith.constant dense<0.000000e+00> : vector<8x32xf32>
    %150 = tpu.matmul %149, %22, %cst_115 {dimension_numbers = #tpu.dot_dimension_numbers<[1], [0], [0], [1], [0, 0, 1, 1], [], []>} : vector<8x32xf32>, vector<32x32xf32>, vector<8x32xf32> -> vector<8x32xf32>
    %151 = vector.extract_strided_slice %143 {offsets = [0, 32], sizes = [8, 32], strides = [1, 1]} : vector<8x64xf32> to vector<8x32xf32>
    %152 = arith.addf %150, %151 : vector<8x32xf32>
    %153 = vector.broadcast %23 : vector<1x32xf32> to vector<8x32xf32>
    %154 = arith.addf %152, %153 : vector<8x32xf32>
    %155 = math.tanh %154 : vector<8x32xf32>
    %c0_116 = arith.constant 0 : index
    %c0_117 = arith.constant 0 : index
    %156 = vector.load %arg19[%c0_116, %c0_117] : memref<8x32xf32, #tpu.memory_space<vmem>>, vector<8x32xf32>
    tpu.vector_store %arg19[%c0_116, %c0_117], %149 {strides = array<i32>} : memref<8x32xf32, #tpu.memory_space<vmem>>, vector<8x32xf32>,
    %c0_118 = arith.constant 0 : index
    %c0_119 = arith.constant 0 : index
    %157 = vector.load %arg20[%c0_118, %c0_119] : memref<8x32xf32, #tpu.memory_space<vmem>>, vector<8x32xf32>
    tpu.vector_store %arg20[%c0_118, %c0_119], %155 {strides = array<i32>} : memref<8x32xf32, #tpu.memory_space<vmem>>, vector<8x32xf32>,
    %158 = arith.index_cast %c5_i32 : i32 to index
    %c0_120 = arith.constant 0 : index
    %c0_121 = arith.constant 0 : index
    %159 = vector.load %arg18[%158, %c0_120, %c0_121] : memref<8x8x32xf32, #tpu.memory_space<vmem>>, vector<1x8x32xf32>
    %160 = vector.shape_cast %159 : vector<1x8x32xf32> to vector<8x32xf32>
    %161 = vector.shape_cast %155 : vector<8x32xf32> to vector<1x8x32xf32>
    tpu.vector_store %arg18[%158, %c0_120, %c0_121], %161 {strides = array<i32>} : memref<8x8x32xf32, #tpu.memory_space<vmem>>, vector<1x8x32xf32>,
    %c6_i32 = arith.constant 6 : i32
    %c0_122 = arith.constant 0 : index
    %c0_123 = arith.constant 0 : index
    %162 = vector.load %arg19[%c0_122, %c0_123] : memref<8x32xf32, #tpu.memory_space<vmem>>, vector<8x32xf32>
    %c0_124 = arith.constant 0 : index
    %c0_125 = arith.constant 0 : index
    %163 = vector.load %arg20[%c0_124, %c0_125] : memref<8x32xf32, #tpu.memory_space<vmem>>, vector<8x32xf32>
    %164 = tpu.concatenate %162, %163 in 1 : vector<8x32xf32>, vector<8x32xf32> -> vector<8x64xf32>
    %cst_126 = arith.constant dense<0.000000e+00> : vector<8x64xf32>
    %165 = tpu.matmul %164, %21, %cst_126 {dimension_numbers = #tpu.dot_dimension_numbers<[1], [0], [0], [1], [0, 0, 1, 1], [], []>} : vector<8x64xf32>, vector<64x64xf32>, vector<8x64xf32> -> vector<8x64xf32>
    %166 = arith.index_cast %c6_i32 : i32 to index
    %c0_127 = arith.constant 0 : index
    %c0_128 = arith.constant 0 : index
    %167 = vector.load %arg17[%166, %c0_127, %c0_128] : memref<8x8x32xf32, #tpu.memory_space<vmem>>, vector<1x8x32xf32>
    %168 = vector.shape_cast %167 : vector<1x8x32xf32> to vector<8x32xf32>
    %169 = vector.extract_strided_slice %165 {offsets = [0, 0], sizes = [8, 32], strides = [1, 1]} : vector<8x64xf32> to vector<8x32xf32>
    %170 = arith.addf %168, %169 : vector<8x32xf32>
    %171 = math.tanh %170 : vector<8x32xf32>
    %cst_129 = arith.constant dense<0.000000e+00> : vector<8x32xf32>
    %172 = tpu.matmul %171, %22, %cst_129 {dimension_numbers = #tpu.dot_dimension_numbers<[1], [0], [0], [1], [0, 0, 1, 1], [], []>} : vector<8x32xf32>, vector<32x32xf32>, vector<8x32xf32> -> vector<8x32xf32>
    %173 = vector.extract_strided_slice %165 {offsets = [0, 32], sizes = [8, 32], strides = [1, 1]} : vector<8x64xf32> to vector<8x32xf32>
    %174 = arith.addf %172, %173 : vector<8x32xf32>
    %175 = vector.broadcast %23 : vector<1x32xf32> to vector<8x32xf32>
    %176 = arith.addf %174, %175 : vector<8x32xf32>
    %177 = math.tanh %176 : vector<8x32xf32>
    %c0_130 = arith.constant 0 : index
    %c0_131 = arith.constant 0 : index
    %178 = vector.load %arg19[%c0_130, %c0_131] : memref<8x32xf32, #tpu.memory_space<vmem>>, vector<8x32xf32>
    tpu.vector_store %arg19[%c0_130, %c0_131], %171 {strides = array<i32>} : memref<8x32xf32, #tpu.memory_space<vmem>>, vector<8x32xf32>,
    %c0_132 = arith.constant 0 : index
    %c0_133 = arith.constant 0 : index
    %179 = vector.load %arg20[%c0_132, %c0_133] : memref<8x32xf32, #tpu.memory_space<vmem>>, vector<8x32xf32>
    tpu.vector_store %arg20[%c0_132, %c0_133], %177 {strides = array<i32>} : memref<8x32xf32, #tpu.memory_space<vmem>>, vector<8x32xf32>,
    %180 = arith.index_cast %c6_i32 : i32 to index
    %c0_134 = arith.constant 0 : index
    %c0_135 = arith.constant 0 : index
    %181 = vector.load %arg18[%180, %c0_134, %c0_135] : memref<8x8x32xf32, #tpu.memory_space<vmem>>, vector<1x8x32xf32>
    %182 = vector.shape_cast %181 : vector<1x8x32xf32> to vector<8x32xf32>
    %183 = vector.shape_cast %177 : vector<8x32xf32> to vector<1x8x32xf32>
    tpu.vector_store %arg18[%180, %c0_134, %c0_135], %183 {strides = array<i32>} : memref<8x8x32xf32, #tpu.memory_space<vmem>>, vector<1x8x32xf32>,
    %c7_i32 = arith.constant 7 : i32
    %c0_136 = arith.constant 0 : index
    %c0_137 = arith.constant 0 : index
    %184 = vector.load %arg19[%c0_136, %c0_137] : memref<8x32xf32, #tpu.memory_space<vmem>>, vector<8x32xf32>
    %c0_138 = arith.constant 0 : index
    %c0_139 = arith.constant 0 : index
    %185 = vector.load %arg20[%c0_138, %c0_139] : memref<8x32xf32, #tpu.memory_space<vmem>>, vector<8x32xf32>
    %186 = tpu.concatenate %184, %185 in 1 : vector<8x32xf32>, vector<8x32xf32> -> vector<8x64xf32>
    %cst_140 = arith.constant dense<0.000000e+00> : vector<8x64xf32>
    %187 = tpu.matmul %186, %21, %cst_140 {dimension_numbers = #tpu.dot_dimension_numbers<[1], [0], [0], [1], [0, 0, 1, 1], [], []>} : vector<8x64xf32>, vector<64x64xf32>, vector<8x64xf32> -> vector<8x64xf32>
    %188 = arith.index_cast %c7_i32 : i32 to index
    %c0_141 = arith.constant 0 : index
    %c0_142 = arith.constant 0 : index
    %189 = vector.load %arg17[%188, %c0_141, %c0_142] : memref<8x8x32xf32, #tpu.memory_space<vmem>>, vector<1x8x32xf32>
    %190 = vector.shape_cast %189 : vector<1x8x32xf32> to vector<8x32xf32>
    %191 = vector.extract_strided_slice %187 {offsets = [0, 0], sizes = [8, 32], strides = [1, 1]} : vector<8x64xf32> to vector<8x32xf32>
    %192 = arith.addf %190, %191 : vector<8x32xf32>
    %193 = math.tanh %192 : vector<8x32xf32>
    %cst_143 = arith.constant dense<0.000000e+00> : vector<8x32xf32>
    %194 = tpu.matmul %193, %22, %cst_143 {dimension_numbers = #tpu.dot_dimension_numbers<[1], [0], [0], [1], [0, 0, 1, 1], [], []>} : vector<8x32xf32>, vector<32x32xf32>, vector<8x32xf32> -> vector<8x32xf32>
    %195 = vector.extract_strided_slice %187 {offsets = [0, 32], sizes = [8, 32], strides = [1, 1]} : vector<8x64xf32> to vector<8x32xf32>
    %196 = arith.addf %194, %195 : vector<8x32xf32>
    %197 = vector.broadcast %23 : vector<1x32xf32> to vector<8x32xf32>
    %198 = arith.addf %196, %197 : vector<8x32xf32>
    %199 = math.tanh %198 : vector<8x32xf32>
    %c0_144 = arith.constant 0 : index
    %c0_145 = arith.constant 0 : index
    %200 = vector.load %arg19[%c0_144, %c0_145] : memref<8x32xf32, #tpu.memory_space<vmem>>, vector<8x32xf32>
    tpu.vector_store %arg19[%c0_144, %c0_145], %193 {strides = array<i32>} : memref<8x32xf32, #tpu.memory_space<vmem>>, vector<8x32xf32>,
    %c0_146 = arith.constant 0 : index
    %c0_147 = arith.constant 0 : index
    %201 = vector.load %arg20[%c0_146, %c0_147] : memref<8x32xf32, #tpu.memory_space<vmem>>, vector<8x32xf32>
    tpu.vector_store %arg20[%c0_146, %c0_147], %199 {strides = array<i32>} : memref<8x32xf32, #tpu.memory_space<vmem>>, vector<8x32xf32>,
    %202 = arith.index_cast %c7_i32 : i32 to index
    %c0_148 = arith.constant 0 : index
    %c0_149 = arith.constant 0 : index
    %203 = vector.load %arg18[%202, %c0_148, %c0_149] : memref<8x8x32xf32, #tpu.memory_space<vmem>>, vector<1x8x32xf32>
    %204 = vector.shape_cast %203 : vector<1x8x32xf32> to vector<8x32xf32>
    %205 = vector.shape_cast %199 : vector<8x32xf32> to vector<1x8x32xf32>
    tpu.vector_store %arg18[%202, %c0_148, %c0_149], %205 {strides = array<i32>} : memref<8x8x32xf32, #tpu.memory_space<vmem>>, vector<1x8x32xf32>,
    %c8_i32 = arith.constant 8 : i32
    %c0_150 = arith.constant 0 : index
    %c0_151 = arith.constant 0 : index
    %206 = vector.load %arg19[%c0_150, %c0_151] : memref<8x32xf32, #tpu.memory_space<vmem>>, vector<8x32xf32>
    %c0_152 = arith.constant 0 : index
    %c0_153 = arith.constant 0 : index
    %c0_154 = arith.constant 0 : index
    %c0_155 = arith.constant 0 : index
    %207 = vector.load %arg16[%c0_152, %c0_153, %c0_154, %c0_155] : memref<1x2x8x32xf32, #tpu.memory_space<vmem>>, vector<1x1x8x32xf32>
    %208 = vector.shape_cast %207 : vector<1x1x8x32xf32> to vector<8x32xf32>
    %209 = vector.shape_cast %206 : vector<8x32xf32> to vector<1x1x8x32xf32>
    tpu.vector_store %arg16[%c0_152, %c0_153, %c0_154, %c0_155], %209 {strides = array<i32>} : memref<1x2x8x32xf32, #tpu.memory_space<vmem>>, vector<1x1x8x32xf32>,
    %c0_156 = arith.constant 0 : index
    %c0_157 = arith.constant 0 : index
    %210 = vector.load %arg20[%c0_156, %c0_157] : memref<8x32xf32, #tpu.memory_space<vmem>>, vector<8x32xf32>
    %c0_158 = arith.constant 0 : index
    %c1_159 = arith.constant 1 : index
    %c0_160 = arith.constant 0 : index
    %c0_161 = arith.constant 0 : index
    %211 = vector.load %arg16[%c0_158, %c1_159, %c0_160, %c0_161] : memref<1x2x8x32xf32, #tpu.memory_space<vmem>>, vector<1x1x8x32xf32>
    %212 = vector.shape_cast %211 : vector<1x1x8x32xf32> to vector<8x32xf32>
    %213 = vector.shape_cast %210 : vector<8x32xf32> to vector<1x1x8x32xf32>
    tpu.vector_store %arg16[%c0_158, %c1_159, %c0_160, %c0_161], %213 {strides = array<i32>} : memref<1x2x8x32xf32, #tpu.memory_space<vmem>>, vector<1x1x8x32xf32>,
    %c0_162 = arith.constant 0 : index
    %c0_163 = arith.constant 0 : index
    %c0_164 = arith.constant 0 : index
    %214 = vector.load %arg18[%c0_162, %c0_163, %c0_164] : memref<8x8x32xf32, #tpu.memory_space<vmem>>, vector<8x8x32xf32>
    %215 = vector.shape_cast %214 : vector<8x8x32xf32> to vector<64x32xf32>
    %216 = arith.truncf %215 : vector<64x32xf32> to vector<64x32xbf16>
    %c0_165 = arith.constant 0 : index
    %c0_166 = arith.constant 0 : index
    %217 = vector.load %arg10[%c0_165, %c0_166] : memref<32x16xbf16, #tpu.memory_space<vmem>>, vector<32x16xbf16>
    %cst_167 = arith.constant dense<0.000000e+00> : vector<64x16xf32>
    %218 = tpu.matmul %216, %217, %cst_167 {dimension_numbers = #tpu.dot_dimension_numbers<[1], [0], [0], [1], [0, 0, 1, 1], [], []>} : vector<64x32xbf16>, vector<32x16xbf16>, vector<64x16xf32> -> vector<64x16xf32>
    %c0_168 = arith.constant 0 : index
    %c0_169 = arith.constant 0 : index
    %219 = vector.load %arg11[%c0_168, %c0_169] : memref<1x16xf32, #tpu.memory_space<vmem>>, vector<1x16xf32>
    %220 = vector.broadcast %219 : vector<1x16xf32> to vector<64x16xf32>
    %221 = arith.addf %218, %220 : vector<64x16xf32>
    %222 = arith.addf %221, %11 : vector<64x16xf32>
    %c0_170 = arith.constant 0 : index
    %c0_171 = arith.constant 0 : index
    %c0_172 = arith.constant 0 : index
    %223 = vector.load %arg3[%c0_170, %c0_171, %c0_172] : memref<1x64x16xf32, #tpu.memory_space<vmem>>, vector<1x64x16xf32>
    %224 = vector.shape_cast %223 : vector<1x64x16xf32> to vector<64x16xf32>
    %cst_173 = arith.constant 0.000000e+00 : f32
    %225 = vector.broadcast %cst_173 : f32 to vector<64x16xf32>
    %226 = arith.cmpf oeq, %224, %225 : vector<64x16xf32>
    %c0_174 = arith.constant 0 : index
    %c0_175 = arith.constant 0 : index
    %c0_176 = arith.constant 0 : index
    %227 = vector.load %arg3[%c0_174, %c0_175, %c0_176] : memref<1x64x16xf32, #tpu.memory_space<vmem>>, vector<1x64x16xf32>
    %228 = vector.shape_cast %227 : vector<1x64x16xf32> to vector<64x16xf32>
    %229 = arith.select %226, %222, %228 : vector<64x16xi1>, vector<64x16xf32>
    %cst_177 = arith.constant dense<0xFF800000> : vector<64xf32>
    %230 = vector.multi_reduction <maximumf>, %229, %cst_177 [1] : vector<64x16xf32> to vector<64xf32>
    %231 = vector.shape_cast %230 : vector<64xf32> to vector<64x1xf32>
    %232 = vector.broadcast %231 : vector<64x1xf32> to vector<64x16xf32>
    %233 = arith.subf %229, %232 : vector<64x16xf32>
    %234 = math.exp %233 : vector<64x16xf32>
    %cst_178 = arith.constant dense<0.000000e+00> : vector<64xf32>
    %235 = vector.multi_reduction <add>, %234, %cst_178 [1] : vector<64x16xf32> to vector<64xf32>
    %236 = vector.shape_cast %235 : vector<64xf32> to vector<64x1xf32>
    %237 = math.log %236 : vector<64x1xf32>
    %238 = vector.broadcast %237 : vector<64x1xf32> to vector<64x16xf32>
    %239 = arith.subf %233, %238 : vector<64x16xf32>
    %c0_179 = arith.constant 0 : index
    %c0_180 = arith.constant 0 : index
    %c0_181 = arith.constant 0 : index
    %240 = vector.load %arg15[%c0_179, %c0_180, %c0_181] : memref<1x64x16xf32, #tpu.memory_space<vmem>>, vector<1x64x16xf32>
    %241 = vector.shape_cast %240 : vector<1x64x16xf32> to vector<64x16xf32>
    %242 = vector.shape_cast %239 : vector<64x16xf32> to vector<1x64x16xf32>
    tpu.vector_store %arg15[%c0_179, %c0_180, %c0_181], %242 {strides = array<i32>} : memref<1x64x16xf32, #tpu.memory_space<vmem>>, vector<1x64x16xf32>,
    return
  }
  func.func @transform_0(%arg0: i32) -> (i32, i32, i32) {
    %c0_i32 = arith.constant 0 : i32
    %c0_i32_0 = arith.constant 0 : i32
    %c0_i32_1 = arith.constant 0 : i32
    return %arg0, %c0_i32, %c0_i32_0 : i32, i32, i32
  }
  func.func @transform_1(%arg0: i32) -> (i32, i32, i32, i32) {
    %c0_i32 = arith.constant 0 : i32
    %c0_i32_0 = arith.constant 0 : i32
    %c0_i32_1 = arith.constant 0 : i32
    %c0_i32_2 = arith.constant 0 : i32
    return %arg0, %c0_i32, %c0_i32_0, %c0_i32_1 : i32, i32, i32, i32
  }
  func.func @transform_2(%arg0: i32) -> (i32, i32, i32) {
    %c0_i32 = arith.constant 0 : i32
    %c0_i32_0 = arith.constant 0 : i32
    %c0_i32_1 = arith.constant 0 : i32
    return %arg0, %c0_i32, %c0_i32_0 : i32, i32, i32
  }
  func.func @transform_3(%arg0: i32) -> (i32, i32, i32) {
    %c0_i32 = arith.constant 0 : i32
    %c0_i32_0 = arith.constant 0 : i32
    %c0_i32_1 = arith.constant 0 : i32
    return %arg0, %c0_i32, %c0_i32_0 : i32, i32, i32
  }
  func.func @transform_4(%arg0: i32) -> (i32, i32) {
    %c0_i32 = arith.constant 0 : i32
    %c0_i32_0 = arith.constant 0 : i32
    %c0_i32_1 = arith.constant 0 : i32
    return %c0_i32, %c0_i32_0 : i32, i32
  }
  func.func @transform_5(%arg0: i32) -> (i32, i32) {
    %c0_i32 = arith.constant 0 : i32
    %c0_i32_0 = arith.constant 0 : i32
    %c0_i32_1 = arith.constant 0 : i32
    return %c0_i32, %c0_i32_0 : i32, i32
  }
  func.func @transform_6(%arg0: i32) -> (i32, i32) {
    %c0_i32 = arith.constant 0 : i32
    %c0_i32_0 = arith.constant 0 : i32
    %c0_i32_1 = arith.constant 0 : i32
    return %c0_i32, %c0_i32_0 : i32, i32
  }
  func.func @transform_7(%arg0: i32) -> (i32, i32) {
    %c0_i32 = arith.constant 0 : i32
    %c0_i32_0 = arith.constant 0 : i32
    %c0_i32_1 = arith.constant 0 : i32
    return %c0_i32, %c0_i32_0 : i32, i32
  }
  func.func @transform_8(%arg0: i32) -> (i32, i32) {
    %c0_i32 = arith.constant 0 : i32
    %c0_i32_0 = arith.constant 0 : i32
    %c0_i32_1 = arith.constant 0 : i32
    return %c0_i32, %c0_i32_0 : i32, i32
  }
  func.func @transform_9(%arg0: i32) -> (i32, i32) {
    %c0_i32 = arith.constant 0 : i32
    %c0_i32_0 = arith.constant 0 : i32
    %c0_i32_1 = arith.constant 0 : i32
    return %c0_i32, %c0_i32_0 : i32, i32
  }
  func.func @transform_10(%arg0: i32) -> (i32, i32) {
    %c0_i32 = arith.constant 0 : i32
    %c0_i32_0 = arith.constant 0 : i32
    %c0_i32_1 = arith.constant 0 : i32
    return %c0_i32, %c0_i32_0 : i32, i32
  }
  func.func @transform_11(%arg0: i32) -> (i32, i32) {
    %c0_i32 = arith.constant 0 : i32
    %c0_i32_0 = arith.constant 0 : i32
    %c0_i32_1 = arith.constant 0 : i32
    return %c0_i32, %c0_i32_0 : i32, i32
  }
  func.func @transform_12(%arg0: i32) -> (i32, i32) {
    %c0_i32 = arith.constant 0 : i32
    %c0_i32_0 = arith.constant 0 : i32
    %c0_i32_1 = arith.constant 0 : i32
    return %c0_i32, %c0_i32_0 : i32, i32
  }
  func.func @transform_13(%arg0: i32) -> (i32, i32) {
    %c0_i32 = arith.constant 0 : i32
    %c0_i32_0 = arith.constant 0 : i32
    %c0_i32_1 = arith.constant 0 : i32
    return %c0_i32, %c0_i32_0 : i32, i32
  }
  func.func @transform_14(%arg0: i32) -> (i32, i32, i32) {
    %c0_i32 = arith.constant 0 : i32
    %c0_i32_0 = arith.constant 0 : i32
    %c0_i32_1 = arith.constant 0 : i32
    return %arg0, %c0_i32, %c0_i32_0 : i32, i32, i32
  }
  func.func @transform_15(%arg0: i32) -> (i32, i32, i32, i32) {
    %c0_i32 = arith.constant 0 : i32
    %c0_i32_0 = arith.constant 0 : i32
    %c0_i32_1 = arith.constant 0 : i32
    %c0_i32_2 = arith.constant 0 : i32
    return %arg0, %c0_i32, %c0_i32_0, %c0_i32_1 : i32, i32, i32, i32
  }
}

</mosaic_0001>

<bundles_post_ra>
// kernel: edge_rnn_forward.1
= control target key start
LH: loop header
LB: loop body
LE: loop exit
PB: predicated region body
PF: predicated region fallthrough
CT: control target
= control target key end

     0   :  { %v3497_v1 = vmov 0   ;;  %vm994_vm0 = vcmask 261120   ;;  %s3498_s21 = smov 32   ;;  %vm925_vm1 = vcmask 1043456   ;;  %vm912_vm2 = vcmask 64512   ;;  %s3502_s25 = smov 96   ;;  %s4291_s11 = inlined_call_operand.vmem [shape: bf16[128,512], index: 11, kind: input, shape index: {}]   ;;  %s4292_s3 = inlined_call_operand.vmem [shape: bf16[1,64,128], index: 3, kind: input, shape index: {}]   ;;  %s4293_s1 = inlined_call_operand.vmem [shape: f32[1,2,8,32], index: 1, kind: input, shape index: {}]   ;;  %s4294_s13 = inlined_call_operand.vmem [shape: bf16[512,16], index: 13, kind: input, shape index: {}]   ;;  %s4295_s4 = inlined_call_operand.vmem [shape: bf16[8,32], index: 4, kind: input, shape index: {}]   ;;  %s4296_s0 = inlined_call_operand.vmem [shape: bf16[1,64,8], index: 0, kind: input, shape index: {}]   ;;  %s4297_s12 = inlined_call_operand.vmem [shape: f32[1,512], index: 12, kind: input, shape index: {}]   ;;  %s4298_s5 = inlined_call_operand.vmem [shape: f32[64,64], index: 5, kind: input, shape index: {}]   ;;  %s4299_s7 = inlined_call_operand.vmem [shape: f32[32,32], index: 7, kind: input, shape index: {}]   ;;  %s4300_s6 = inlined_call_operand.vmem [shape: f32[1,32], index: 6, kind: input, shape index: {}]   ;;  %s4301_s8 = inlined_call_operand.vmem [shape: f32[1,32], index: 8, kind: input, shape index: {}]   ;;  %s4302_s9 = inlined_call_operand.vmem [shape: bf16[32,16], index: 9, kind: input, shape index: {}]   ;;  %s4303_s15 = inlined_call_operand.vmem [shape: f32[1,2,8,32], index: 15, kind: output, shape index: {1}]   ;;  %s4304_s10 = inlined_call_operand.vmem [shape: f32[1,16], index: 10, kind: input, shape index: {}]   ;;  %s4305_s2 = inlined_call_operand.vmem [shape: f32[1,64,16], index: 2, kind: input, shape index: {}]   ;;  %s4306_s14 = inlined_call_operand.vmem [shape: f32[1,64,16], index: 14, kind: output, shape index: {0}]  }
   0x1   :  { %v3343_v0 = vld [vmem:[%s4291_s11 + $0x4] ss:$16 sps:$4 sm:$0xff]   ;;  %328 = vmatprep.mubr.bf16.mxu0 %v3497_v1  ;;  %401 = vmatprep.mubr.bf16.mxu1 %v3497_v1  ;;  %v3345_v2 = vld [vmem:[%s4291_s11 + $0xc] ss:$16 sps:$4 sm:$0xff]   ;;  %v3347_v3 = vld [vmem:[%s4291_s11] ss:$16 sps:$4 sm:$0xff]  }
   0x2   :  { %296 = vmatprep.subr.bf16.mxu0 %v3343_v0  ;;  %v3348_v4 = vld [vmem:[%s4291_s11 + $0x8] ss:$16 sps:$4 sm:$0xff]   ;;  %369 = vmatprep.subr.bf16.mxu1 %v3345_v2  ;;  %v3349_v5 = vld [vmem:[%s4291_s11 + $0x24] ss:$16 sps:$4 sm:$0xff]   ;;  %v3351_v6 = vld [vmem:[%s4291_s11 + $0x2c] ss:$16 sps:$4 sm:$0xff]  }
   0x3   :  { %297 = vmatpush1.bf16.msra.mxu0 %v3347_v3  ;;  %370 = vmatpush1.bf16.msra.mxu1 %v3348_v4  ;;  %v3353_v7 = vld [vmem:[%s4291_s11 + $0x20] ss:$16 sps:$4 sm:$0xff]   ;;  %v3354_v8 = vld [vmem:[%s4291_s11 + $0x28] ss:$16 sps:$4 sm:$0xff]   ;;  %v3355_v9 = vld [vmem:[%s4291_s11 + $0x44] ss:$16 sps:$4 sm:$0xff]  }
   0x4   :  { %298 = vmatprep.subr.bf16.mxu0 %v3349_v5  ;;  %371 = vmatprep.subr.bf16.mxu1 %v3351_v6  ;;  %v3357_v10 = vld [vmem:[%s4291_s11 + $0x4c] ss:$16 sps:$4 sm:$0xff]   ;;  %v3359_v11 = vld [vmem:[%s4291_s11 + $0x40] ss:$16 sps:$4 sm:$0xff]   ;;  %v3360_v12 = vld [vmem:[%s4291_s11 + $0x48] ss:$16 sps:$4 sm:$0xff]  }
   0x5   :  { %v3361_v13 = vld [vmem:[%s4291_s11 + $0x64] ss:$16 sps:$4 sm:$0xff]   ;;  %v3363_v14 = vld [vmem:[%s4291_s11 + $0x6c] ss:$16 sps:$4 sm:$0xff]   ;;  %v3365_v15 = vld [vmem:[%s4291_s11 + $0x60] ss:$16 sps:$4 sm:$0xff]  }
   0x6   :  { %v3366_v16 = vld [vmem:[%s4291_s11 + $0x68] ss:$16 sps:$4 sm:$0xff]   ;;  %v3367_v17 = vld [vmem:[%s4291_s11 + $0x84] ss:$16 sps:$4 sm:$0xff]   ;;  %v3369_v18 = vld [vmem:[%s4291_s11 + $0x8c] ss:$16 sps:$4 sm:$0xff]  }
   0x7   :  { %299 = vmatpush1.bf16.msra.mxu0 %v3353_v7  ;;  %372 = vmatpush1.bf16.msra.mxu1 %v3354_v8  ;;  %v3371_v19 = vld [vmem:[%s4291_s11 + $0x80] ss:$16 sps:$4 sm:$0xff]   ;;  %v3372_v20 = vld [vmem:[%s4291_s11 + $0x88] ss:$16 sps:$4 sm:$0xff]   ;;  %v3373_v21 = vld [vmem:[%s4291_s11 + $0xa4] ss:$16 sps:$4 sm:$0xff]  }
   0x8   :  { %300 = vmatprep.subr.bf16.mxu0 %v3355_v9  ;;  %373 = vmatprep.subr.bf16.mxu1 %v3357_v10  ;;  %v3375_v22 = vld [vmem:[%s4291_s11 + $0xac] ss:$16 sps:$4 sm:$0xff]   ;;  %v3377_v23 = vld [vmem:[%s4291_s11 + $0xa0] ss:$16 sps:$4 sm:$0xff]   ;;  %v3378_v24 = vld [vmem:[%s4291_s11 + $0xa8] ss:$16 sps:$4 sm:$0xff]  }
   0x9   :  { %v3379_v25 = vld [vmem:[%s4291_s11 + $0xc4] ss:$16 sps:$4 sm:$0xff]   ;;  %v3381_v26 = vld [vmem:[%s4291_s11 + $0xcc] ss:$16 sps:$4 sm:$0xff]   ;;  %v3383_v27 = vld [vmem:[%s4291_s11 + $0xc0] ss:$16 sps:$4 sm:$0xff]  }
   0xa   :  { %v3384_v28 = vld [vmem:[%s4291_s11 + $0xc8] ss:$16 sps:$4 sm:$0xff]   ;;  %v3385_v29 = vld [vmem:[%s4291_s11 + $0xe4] ss:$16 sps:$4 sm:$0xff]   ;;  %v3387_v30 = vld [vmem:[%s4291_s11 + $0xec] ss:$16 sps:$4 sm:$0xff]  }
   0xb   :  { %301 = vmatpush1.bf16.msra.mxu0 %v3359_v11  ;;  %374 = vmatpush1.bf16.msra.mxu1 %v3360_v12  ;;  %v2701_v31 = vld [vmem:[%s4293_s1 + $0x8] sm:$0xff]  ;;  %v1016_v32 = vld [vmem:[%s4293_s1] sm:$0xff]  ;;  %v3403_v46 = vld [vmem:[%s4294_s13 + $0x50] sm:$0xff]   ;;  %v3499_v10 = vmov 0.0|0.0   ;;  %v92_v11 = vlaneseq  ;;  %vm3500_vm3 = vmmov 0   ;;  %vm1028_vm4 = vcmask 523264  }
   0xc   :  { %302 = vmatprep.subr.bf16.mxu0 %v3361_v13  ;;  %375 = vmatprep.subr.bf16.mxu1 %v3363_v14  ;;  %v3389_v33 = vld [vmem:[%s4291_s11 + $0xe0] ss:$16 sps:$4 sm:$0xff]   ;;  %1020 = vst.msk [vmem:[#allocation5] sm:$0xff] %vm994_vm0, %v2701_v31  ;;  %1017 = vst.msk [vmem:[#allocation4] sm:$0xff] %vm994_vm0, %v1016_v32  ;;  %v3390_v34 = vld [vmem:[%s4291_s11 + $0xe8] ss:$16 sps:$4 sm:$0xff]  }
   0xd   :  { %v3395_v35 = vld [vmem:[%s4294_s13 + $0x40] sm:$0xff]   ;;  %v3399_v40 = vld [vmem:[%s4294_s13 + $0x48] sm:$0xff]   ;;  %v3405_v47 = vld [vmem:[%s4294_s13 + $0xd0] sm:$0xff]   ;;  %v93_v12 = vshrl.u32 %v92_v11, 7  ;;  %vm2511_vm6 = vcmask 130048  }
   0xe   :  { %v3397_v36 = vld [vmem:[%s4294_s13 + $0xc0] sm:$0xff]   ;;  %v3401_v42 = vld [vmem:[%s4294_s13 + $0xc8] sm:$0xff]   ;;  %v3404_v48 = vld [vmem:[%s4294_s13 + $0x10] sm:$0xff]  }
   0xf   :  { %303 = vmatpush1.bf16.msra.mxu0 %v3365_v15  ;;  %376 = vmatpush1.bf16.msra.mxu1 %v3366_v16  ;;  %v3391_v37 = vld [vmem:[%s4292_s3] sm:$0xff]   ;;  %v3400_v43 = vld [vmem:[%s4294_s13 + $0x8] sm:$0xff]   ;;  %v3406_v49 = vld [vmem:[%s4294_s13 + $0x90] sm:$0xff]   ;;  %v94_v13 = vsub.s32 0, %v93_v12  ;;  %v102_v14 = vsub.s32 2, %v93_v12  ;;  %v98_v16 = vsub.s32 1, %v93_v12 }
  0x10   :  { %304 = vmatprep.subr.bf16.mxu0 %v3367_v17  ;;  %377 = vmatprep.subr.bf16.mxu1 %v3369_v18  ;;  %v3396_v38 = vld [vmem:[%s4294_s13] sm:$0xff]   ;;  %v3402_v44 = vld [vmem:[%s4294_s13 + $0x88] sm:$0xff]   ;;  %v3407_v50 = vld [vmem:[%s4294_s13 + $0x58] sm:$0xff]   ;;  %v106_v17 = vsub.s32 3, %v93_v12 }
  0x11   :  { %v3398_v39 = vld [vmem:[%s4294_s13 + $0x80] sm:$0xff]   ;;  %v3392_v45 = vld [vmem:[%s4292_s3 + $0x8] sm:$0xff]   ;;  %v3409_v51 = vld [vmem:[%s4294_s13 + $0xd8] sm:$0xff]  }
  0x12   :  { %v3408_v52 = vld [vmem:[%s4294_s13 + $0x18] sm:$0xff]   ;;  %v3393_v54 = vld [vmem:[%s4292_s3 + $0x10] sm:$0xff]   ;;  %v3411_v55 = vld [vmem:[%s4294_s13 + $0x60] sm:$0xff]  }
  0x13   :  { %305 = vmatpush1.bf16.msra.mxu0 %v3371_v19  ;;  %378 = vmatpush1.bf16.msra.mxu1 %v3372_v20  ;;  %v1022_v41 = vld [vmem:[#allocation5] sm:$0xff]  ;;  %v3410_v53 = vld [vmem:[%s4294_s13 + $0x98] sm:$0xff]   ;;  %v3413_v56 = vld [vmem:[%s4294_s13 + $0xe0] sm:$0xff]  }
  0x14   :  { %306 = vmatprep.subr.bf16.mxu0 %v3373_v21  ;;  %379 = vmatprep.subr.bf16.mxu1 %v3375_v22  ;;  %v3412_v57 = vld [vmem:[%s4294_s13 + $0x20] sm:$0xff]   ;;  %v3415_v59 = vld [vmem:[%s4294_s13 + $0x68] sm:$0xff]   ;;  %v3394_v62 = vld [vmem:[%s4292_s3 + $0x18] sm:$0xff]  }
  0x15   :  { %1024 = vrot.lane.b32.xlu0 %v1022_v41, %s3498_s21  ;;  %v3414_v58 = vld [vmem:[%s4294_s13 + $0xa0] sm:$0xff]   ;;  %v3417_v60 = vld [vmem:[%s4294_s13 + $0xe8] sm:$0xff]   ;;  %v3419_v0 = vld [vmem:[%s4294_s13 + $0x70] sm:$0xff]  }
  0x16   :  { %v3416_v61 = vld [vmem:[%s4294_s13 + $0x28] sm:$0xff]   ;;  %v3420_v2 = vld [vmem:[%s4294_s13 + $0x30] sm:$0xff]   ;;  %v3423_v4 = vld [vmem:[%s4294_s13 + $0x78] sm:$0xff]  }
  0x17   :  { %307 = vmatpush1.bf16.msra.mxu0 %v3377_v23  ;;  %380 = vmatpush1.bf16.msra.mxu1 %v3378_v24  ;;  %v3418_v63 = vld [vmem:[%s4294_s13 + $0xa8] sm:$0xff]   ;;  %v3422_v3 = vld [vmem:[%s4294_s13 + $0xb0] sm:$0xff]   ;;  %v3425_v5 = vld [vmem:[%s4294_s13 + $0xf8] sm:$0xff]  }
  0x18   :  { %308 = vmatprep.subr.bf16.mxu0 %v3379_v25  ;;  %381 = vmatprep.subr.bf16.mxu1 %v3381_v26  ;;  %v3424_v6 = vld [vmem:[%s4294_s13 + $0x38] sm:$0xff]   ;;  %v884_v8 = vld [vmem:[%s4295_s4] sm:$0xf] }
  0x19   :  { %v3426_v7 = vld [vmem:[%s4294_s13 + $0xb8] sm:$0xff]   ;;  %v3807_v9 = vsel %vm925_vm1, %v884_v8, 0  ;;  %v90_v15 = vld [vmem:[%s4297_s12] sm:$0xf] }
  0x1a   :  { %v3813_v18 = vrot.slane %v90_v15, %v94_v13  ;;  %v3815_v19 = vrot.slane %v90_v15, %v102_v14  ;;  %v3817_v20 = vrot.slane %v90_v15, %v98_v16  ;;  %v3819_v21 = vrot.slane %v90_v15, %v106_v17  ;;  %v1007_v15 = vld [vmem:[%s4298_s5 + $0x20] sm:$0xff]  ;;  %v1008_v16 = vld [vmem:[%s4298_s5 + $0x28] sm:$0xff] }
  0x1b   :  { %309 = vmatpush1.bf16.msra.mxu0 %v3383_v27  ;;  %382 = vmatpush1.bf16.msra.mxu1 %v3384_v28 }
  0x1c   :  { %310 = vmatprep.subr.bf16.mxu0 %v3385_v29  ;;  %383 = vmatprep.subr.bf16.mxu1 %v3387_v30 }
  0x1f   :  { %311 = vmatpush1.bf16.msra.mxu0 %v3389_v33  ;;  %384 = vmatpush1.bf16.msra.mxu1 %v3390_v34 }
  0x20   :  { %2727 = vmatprep.subr.bf16.mxu0 %v3395_v35  ;;  %2767 = vmatprep.subr.bf16.mxu1 %v3397_v36 }
  0x22   :  { %329 = vmatmul.mubr.bf16.vlgmr.msra.gmra.mrb[0].mxu0 %v3391_v37  ;;  %402 = vmatmul.mubr.bf16.vlgmr.msra.gmra.mrb[0].mxu1 %v3391_v37 }
  0x23   :  { %338 = vmatprep.mubr.bf16.mxu0 %v3497_v1  ;;  %411 = vmatprep.mubr.bf16.mxu1 %v3497_v1 }
  0x24   :  { %2728 = vmatpush3.bf16.msra.mxu0 %v3396_v38  ;;  %2768 = vmatpush3.bf16.msra.mxu1 %v3398_v39 }
  0x25   :  { %2729 = vmatprep.subr.bf16.mxu0 %v3399_v40  ;;  %2769 = vmatprep.subr.bf16.mxu1 %v3401_v42 }
  0x28   :  { %2730 = vmatpush3.bf16.msra.mxu0 %v3400_v43  ;;  %2770 = vmatpush3.bf16.msra.mxu1 %v3402_v44  ;;  %v1003_v43 = vld [vmem:[%s4298_s5] sm:$0xff]  ;;  %v1004_v44 = vld [vmem:[%s4298_s5 + $0x8] sm:$0xff] }
  0x29   :  { %2731 = vmatprep.subr.bf16.mxu0 %v3403_v46  ;;  %2771 = vmatprep.subr.bf16.mxu1 %v3405_v47 }
  0x2a   :  { %339 = vmatmul.mubr.bf16.gmra.mrb[4].mxu0 %v3392_v45  ;;  %412 = vmatmul.mubr.bf16.gmra.mrb[4].mxu1 %v3392_v45 }
  0x2b   :  { %348 = vmatprep.mubr.bf16.mxu0 %v3497_v1  ;;  %421 = vmatprep.mubr.bf16.mxu1 %v3497_v1 }
  0x2c   :  { %2732 = vmatpush3.bf16.msra.mxu0 %v3404_v48  ;;  %2772 = vmatpush3.bf16.msra.mxu1 %v3406_v49 }
  0x2d   :  { %2733 = vmatprep.subr.bf16.mxu0 %v3407_v50  ;;  %2773 = vmatprep.subr.bf16.mxu1 %v3409_v51 }
  0x30   :  { %2734 = vmatpush3.bf16.msra.mxu0 %v3408_v52  ;;  %2774 = vmatpush3.bf16.msra.mxu1 %v3410_v53 }
  0x31   :  { %2735 = vmatprep.subr.bf16.mxu0 %v3411_v55  ;;  %2775 = vmatprep.subr.bf16.mxu1 %v3413_v56 }
  0x32   :  { %349 = vmatmul.mubr.bf16.gmra.mrb[8].mxu0 %v3393_v54  ;;  %422 = vmatmul.mubr.bf16.gmra.mrb[8].mxu1 %v3393_v54  ;;  %v3835_v54 = vpack.c.bf16 %v1004_v44, %v1003_v43 }
  0x33   :  { %358 = vmatprep.mubr.bf16.mxu0 %v3497_v1  ;;  %431 = vmatprep.mubr.bf16.mxu1 %v3497_v1  ;;  %v3421_v1 = vld [vmem:[%s4294_s13 + $0xf0] sm:$0xff]  }
  0x34   :  { %2736 = vmatpush3.bf16.msra.mxu0 %v3412_v57  ;;  %2776 = vmatpush3.bf16.msra.mxu1 %v3414_v58 }
  0x35   :  { %2737 = vmatprep.subr.bf16.mxu0 %v3415_v59  ;;  %2777 = vmatprep.subr.bf16.mxu1 %v3417_v60  ;;  %v1005_v59 = vld [vmem:[%s4298_s5 + $0x10] sm:$0xff]  ;;  %v1006_v60 = vld [vmem:[%s4298_s5 + $0x18] sm:$0xff] }
  0x36   :  { %v3853_v11 = vpack.c.bf16 %v1006_v60, %v1005_v59 }
  0x38   :  { %2738 = vmatpush3.bf16.msra.mxu0 %v3416_v61  ;;  %2778 = vmatpush3.bf16.msra.mxu1 %v3418_v63 }
  0x39   :  { %2739 = vmatprep.subr.bf16.mxu0 %v3419_v0  ;;  %2779 = vmatprep.subr.bf16.mxu1 %v3421_v1 }
  0x3a   :  { %359 = vmatmul.mubr.bf16.gmra.mrb[12].mxu0 %v3394_v62  ;;  %432 = vmatmul.mubr.bf16.gmra.mrb[12].mxu1 %v3394_v62 }
  0x3c   :  { %2740 = vmatpush3.bf16.msra.mxu0 %v3420_v2  ;;  %2780 = vmatpush3.bf16.msra.mxu1 %v3422_v3 }
  0x3d   :  { %2741 = vmatprep.subr.bf16.mxu0 %v3423_v4  ;;  %2781 = vmatprep.subr.bf16.mxu1 %v3425_v5 }
  0x40   :  { %2742 = vmatpush3.bf16.msra.mxu0 %v3424_v6  ;;  %2782 = vmatpush3.bf16.msra.mxu1 %v3426_v7 }
  0x41   :  { %3336 = vmatprep.subr.msk.bf16.mxu0 %vm925_vm1, %v884_v8  ;;  %3192 = vmatprep.subr.bf16.mxu1 %v3499_v10 }
  0xf5   :  { %v330_v22 = vpop.f32.mrb[0].mxu0  ;;  %v403_v23 = vpop.f32.mrb[0].mxu1 }
  0xf6   :  { %v331_v24 = vadd.f32 %v330_v22, %v3813_v18  ;;  %v404_v25 = vadd.f32 %v403_v23, %v3815_v19  ;;  %v332_v26 = vpop.f32.mrb[1].mxu0  ;;  %v405_v27 = vpop.f32.mrb[1].mxu1 }
  0xf7   :  { %v333_v28 = vadd.f32 %v332_v26, %v3817_v20  ;;  %v406_v29 = vadd.f32 %v405_v27, %v3819_v21  ;;  %v334_v30 = vpop.f32.mrb[2].mxu0  ;;  %v407_v31 = vpop.f32.mrb[2].mxu1 }
  0xf8   :  { %v444_v32 = vmax.f32 %v404_v25, 0.0  ;;  %v335_v33 = vadd.f32 %v334_v30, %v3813_v18  ;;  %v408_v34 = vadd.f32 %v407_v31, %v3815_v19  ;;  %v336_v35 = vpop.f32.mrb[3].mxu0  ;;  %v409_v36 = vpop.f32.mrb[3].mxu1  ;;  %v442_v40 = vmax.f32 %v331_v24, 0.0 }
  0xf9   :  { %v445_v37 = vmax.f32 %v406_v29, 0.0  ;;  %v337_v38 = vadd.f32 %v336_v35, %v3817_v20  ;;  %v410_v39 = vadd.f32 %v409_v36, %v3819_v21  ;;  %v443_v45 = vmax.f32 %v333_v28, 0.0  ;;  %v1010_v35 = vld [vmem:[%s4298_s5 + $0x38] sm:$0xff] }
  0xfa   :  { %v446_v41 = vmax.f32 %v335_v33, 0.0  ;;  %v448_v42 = vmax.f32 %v408_v34, 0.0  ;;  %v3864_v29 = vpack.c.bf16 %v1008_v16, %v1007_v15  ;;  %v1009_v34 = vld [vmem:[%s4298_s5 + $0x30] sm:$0xff] }
  0xfb   :  { %v447_v46 = vmax.f32 %v337_v38, 0.0  ;;  %v449_v47 = vmax.f32 %v410_v39, 0.0 }
  0xfc   :  { %v474_v48 = vpack.c.bf16 %v446_v41, %v442_v40  ;;  %v476_v49 = vpack.c.bf16 %v448_v42, %v444_v32 }
  0xfd   :  { %v475_v50 = vpack.c.bf16 %v447_v46, %v443_v45  ;;  %v477_v51 = vpack.c.bf16 %v449_v47, %v445_v37  ;;  %v340_v52 = vpop.f32.mrb[4].mxu0  ;;  %v413_v53 = vpop.f32.mrb[4].mxu1 }
  0xfe   :  { %v341_v55 = vadd.f32 %v340_v52, %v3813_v18  ;;  %v414_v56 = vadd.f32 %v413_v53, %v3815_v19  ;;  %v342_v57 = vpop.f32.mrb[5].mxu0  ;;  %v415_v58 = vpop.f32.mrb[5].mxu1 }
  0xff   :  { %v343_v61 = vadd.f32 %v342_v57, %v3817_v20  ;;  %v416_v62 = vadd.f32 %v415_v58, %v3819_v21  ;;  %v344_v63 = vpop.f32.mrb[6].mxu0  ;;  %v417_v0 = vpop.f32.mrb[6].mxu1  ;;  %778 = vmatprep.mubr.bf16.mxu0 %v475_v50  ;;  %843 = vmatprep.mubr.bf16.mxu1 %v477_v51 }
 0x100   :  { %v452_v1 = vmax.f32 %v414_v56, 0.0  ;;  %v345_v2 = vadd.f32 %v344_v63, %v3813_v18  ;;  %v418_v3 = vadd.f32 %v417_v0, %v3815_v19  ;;  %v346_v4 = vpop.f32.mrb[7].mxu0  ;;  %v419_v5 = vpop.f32.mrb[7].mxu1  ;;  %779 = vmatmul.mubr.bf16.vlgmr.msra.gmra.mrb[16].mxu0 %v474_v48  ;;  %844 = vmatmul.mubr.bf16.vlgmr.msra.gmra.mrb[16].mxu1 %v476_v49  ;;  %v450_v12 = vmax.f32 %v341_v55, 0.0 }
 0x101   :  { %v453_v6 = vmax.f32 %v416_v62, 0.0  ;;  %v347_v7 = vadd.f32 %v346_v4, %v3817_v20  ;;  %v420_v8 = vadd.f32 %v419_v5, %v3819_v21  ;;  %2931 = vmatpush3.bf16.msra.mxu0 %v3807_v9  ;;  %3194 = vmatpush3.bf16.msra.mxu1 %v3835_v54  ;;  %v451_v9 = vmax.f32 %v343_v61, 0.0 }
 0x102   :  { %v454_v13 = vmax.f32 %v345_v2, 0.0  ;;  %v456_v14 = vmax.f32 %v418_v3, 0.0  ;;  %3195 = vmatprep.subr.bf16.mxu1 %v3499_v10  ;;  %3210 = vmatprep.subr.bf16.mxu0 %v3499_v10  ;;  %v3882_v48 = vpack.c.bf16 %v1010_v35, %v1009_v34  ;;  %v1012_v34 = vld [vmem:[%s4299_s7 + $0x8] sm:$0xff] }
 0x103   :  { %v455_v17 = vmax.f32 %v347_v7, 0.0  ;;  %v457_v22 = vmax.f32 %v420_v8, 0.0 }
 0x104   :  { %v478_v23 = vpack.c.bf16 %v454_v13, %v450_v12  ;;  %v480_v24 = vpack.c.bf16 %v456_v14, %v452_v1 }
 0x105   :  { %v479_v25 = vpack.c.bf16 %v455_v17, %v451_v9  ;;  %v481_v26 = vpack.c.bf16 %v457_v22, %v453_v6  ;;  %v350_v27 = vpop.f32.mrb[8].mxu0  ;;  %v423_v28 = vpop.f32.mrb[8].mxu1  ;;  %3197 = vmatpush3.bf16.msra.mxu1 %v3853_v11 }
 0x106   :  { %v351_v30 = vadd.f32 %v350_v27, %v3813_v18  ;;  %v424_v31 = vadd.f32 %v423_v28, %v3815_v19  ;;  %v352_v32 = vpop.f32.mrb[9].mxu0  ;;  %v425_v33 = vpop.f32.mrb[9].mxu1  ;;  %3198 = vmatprep.subr.bf16.mxu1 %v3499_v10 }
 0x107   :  { %v353_v36 = vadd.f32 %v352_v32, %v3817_v20  ;;  %v426_v37 = vadd.f32 %v425_v33, %v3819_v21  ;;  %v354_v38 = vpop.f32.mrb[10].mxu0  ;;  %v427_v39 = vpop.f32.mrb[10].mxu1  ;;  %786 = vmatprep.mubr.bf16.mxu0 %v479_v25  ;;  %851 = vmatprep.mubr.bf16.mxu1 %v481_v26  ;;  %v1011_v33 = vld [vmem:[%s4299_s7] sm:$0xff] }
 0x108   :  { %v460_v40 = vmax.f32 %v424_v31, 0.0  ;;  %v355_v41 = vadd.f32 %v354_v38, %v3813_v18  ;;  %v428_v42 = vadd.f32 %v427_v39, %v3815_v19  ;;  %v356_v43 = vpop.f32.mrb[11].mxu0  ;;  %v429_v44 = vpop.f32.mrb[11].mxu1  ;;  %787 = vmatmul.mubr.bf16.gmra.mrb[20].mxu0 %v478_v23  ;;  %852 = vmatmul.mubr.bf16.gmra.mrb[20].mxu1 %v480_v24  ;;  %v458_v49 = vmax.f32 %v351_v30, 0.0  ;;  %v1021_v30 = vld [vmem:[#allocation4] sm:$0xff]  ;;  %v3428_v31 = vld [vmem:[%s4296_s0 + $0x8] sm:$0xff]  }
 0x109   :  { %v461_v45 = vmax.f32 %v426_v37, 0.0  ;;  %v357_v46 = vadd.f32 %v356_v43, %v3817_v20  ;;  %v430_v47 = vadd.f32 %v429_v44, %v3819_v21  ;;  %3200 = vmatpush3.bf16.msra.mxu1 %v3864_v29  ;;  %v459_v52 = vmax.f32 %v353_v36, 0.0  ;;  %v1013_v36 = vld [vmem:[%s4299_s7 + $0x10] sm:$0xff]  ;;  %v1014_v37 = vld [vmem:[%s4299_s7 + $0x18] sm:$0xff] }
 0x10a   :  { %v462_v50 = vmax.f32 %v355_v41, 0.0  ;;  %v464_v51 = vmax.f32 %v428_v42, 0.0  ;;  %3201 = vmatprep.subr.bf16.mxu1 %v3499_v10  ;;  %v3923_v35 = vpack.c.bf16 %v1012_v34, %v1011_v33  ;;  %v3933_v38 = vpack.c.bf16 %v1014_v37, %v1013_v36 }
 0x10b   :  { %v463_v53 = vmax.f32 %v357_v46, 0.0  ;;  %v465_v55 = vmax.f32 %v430_v47, 0.0 }
 0x10c   :  { %v482_v56 = vpack.c.bf16 %v462_v50, %v458_v49  ;;  %v484_v57 = vpack.c.bf16 %v464_v51, %v460_v40 }
 0x10d   :  { %v483_v58 = vpack.c.bf16 %v463_v53, %v459_v52  ;;  %v485_v59 = vpack.c.bf16 %v465_v55, %v461_v45  ;;  %v360_v60 = vpop.f32.mrb[12].mxu0  ;;  %v433_v61 = vpop.f32.mrb[12].mxu1  ;;  %3203 = vmatpush3.bf16.msra.mxu1 %v3882_v48 }
 0x10e   :  { %v361_v62 = vadd.f32 %v360_v60, %v3813_v18  ;;  %v434_v63 = vadd.f32 %v433_v61, %v3815_v19  ;;  %v362_v0 = vpop.f32.mrb[13].mxu0  ;;  %v435_v1 = vpop.f32.mrb[13].mxu1  ;;  %3204 = vmatprep.subr.bf16.mxu1 %v3499_v10 }
 0x10f   :  { %v363_v2 = vadd.f32 %v362_v0, %v3817_v20  ;;  %v436_v3 = vadd.f32 %v435_v1, %v3819_v21  ;;  %v364_v4 = vpop.f32.mrb[14].mxu0  ;;  %v437_v5 = vpop.f32.mrb[14].mxu1  ;;  %794 = vmatprep.mubr.bf16.mxu0 %v483_v58  ;;  %859 = vmatprep.mubr.bf16.mxu1 %v485_v59 }
 0x110   :  { %v468_v6 = vmax.f32 %v434_v63, 0.0  ;;  %v365_v7 = vadd.f32 %v364_v4, %v3813_v18  ;;  %v438_v8 = vadd.f32 %v437_v5, %v3815_v19  ;;  %v366_v12 = vpop.f32.mrb[15].mxu0  ;;  %v439_v13 = vpop.f32.mrb[15].mxu1  ;;  %795 = vmatmul.mubr.bf16.gmra.mrb[24].mxu0 %v482_v56  ;;  %860 = vmatmul.mubr.bf16.gmra.mrb[24].mxu1 %v484_v57  ;;  %v466_v9 = vmax.f32 %v361_v62, 0.0  ;;  %v3427_v19 = vld [vmem:[%s4296_s0] sm:$0xff]  }
 0x111   :  { %v469_v14 = vmax.f32 %v436_v3, 0.0  ;;  %v367_v15 = vadd.f32 %v366_v12, %v3817_v20  ;;  %v440_v16 = vadd.f32 %v439_v13, %v3819_v21  ;;  %v467_v23 = vmax.f32 %v363_v2, 0.0  ;;  %v1025_v21 = vpop.permute.xlu0 %1024 }
 0x112   :  { %v470_v17 = vmax.f32 %v365_v7, 0.0  ;;  %v472_v22 = vmax.f32 %v438_v8, 0.0  ;;  %v3501_v20 = vmov 0.0   ;;  %v1027_v32 = vsel %vm994_vm0, %v1021_v30, %v1025_v21 }
 0x113   :  { %v471_v24 = vmax.f32 %v367_v15, 0.0  ;;  %v473_v25 = vmax.f32 %v440_v16, 0.0 }
 0x114   :  { %v486_v26 = vpack.c.bf16 %v470_v17, %v466_v9  ;;  %v488_v27 = vpack.c.bf16 %v472_v22, %v468_v6 }
 0x115   :  { %v487_v18 = vpack.c.bf16 %v471_v24, %v467_v23  ;;  %v489_v28 = vpack.c.bf16 %v473_v25, %v469_v14 }
 0x117   :  { %802 = vmatprep.mubr.bf16.mxu0 %v487_v18  ;;  %867 = vmatprep.mubr.bf16.mxu1 %v489_v28 }
 0x118   :  { %803 = vmatmul.mubr.bf16.gmra.mrb[28].mxu0 %v486_v26  ;;  %868 = vmatmul.mubr.bf16.gmra.mrb[28].mxu1 %v488_v27 }
 0x119   :  { %2932 = vmatprep.mubr.msk.bf16.mxu0 %vm912_vm2, %v3427_v19  ;;  %2956 = vmatprep.mubr.msk.f32.mxu1 %vm3500_vm3, %v3501_v20 }
 0x120   :  { %2933 = vmatmul.mubr.msk.bf16.vlgmr.msra.gmra.mrb[32].mxu0 %vm912_vm2, %v3428_v31  ;;  %2957 = vmatmul.mubr.msk.f32.vlgmr.msra.gmra.mrb[32].mxu1 %vm1028_vm4, %v1027_v32 }
 0x121   :  { %2967 = vmatprep.mubr.msk.f32.mxu1 %vm3500_vm3, %v3501_v20  ;;  %3212 = vmatpush3.bf16.msra.mxu0 %v3835_v54 }
 0x122   :  { %3213 = vmatprep.subr.bf16.mxu0 %v3499_v10  ;;  %3206 = vmatpush3.bf16.msra.mxu1 %v3923_v35 }
 0x123   :  { %3207 = vmatprep.subr.bf16.mxu1 %v3499_v10 }
 0x125   :  { %3215 = vmatpush3.bf16.msra.mxu0 %v3853_v11 }
 0x126   :  { %3216 = vmatprep.subr.bf16.mxu0 %v3499_v10  ;;  %3209 = vmatpush3.bf16.msra.mxu1 %v3933_v38 }
 0x127   :  { %3222 = vmatprep.subr.bf16.mxu1 %v3499_v10 }
 0x129   :  { %3218 = vmatpush3.bf16.msra.mxu0 %v3864_v29 }
 0x12a   :  { %3219 = vmatprep.subr.bf16.mxu0 %v3499_v10 }
 0x12d   :  { %3221 = vmatpush3.bf16.msra.mxu0 %v3882_v48 }
 0x12e   :  { %3228 = vmatprep.subr.bf16.mxu0 %v3499_v10 }
 0x1d3   :  { %v2743_v39 = vpop.f32.mrb[16].mxu0  ;;  %v2783_v40 = vpop.f32.mrb[16].mxu1 }
 0x1d4   :  { %v2744_v41 = vpop.f32.mrb[17].mxu0  ;;  %v2784_v42 = vpop.f32.mrb[17].mxu1 }
 0x1d5   :  { %v2745_v43 = vadd.f32 %v2744_v41, %v2743_v39  ;;  %v2785_v44 = vadd.f32 %v2784_v42, %v2783_v40  ;;  %v2746_v45 = vpop.f32.mrb[18].mxu0  ;;  %v2786_v46 = vpop.f32.mrb[18].mxu1  ;;  %v2692_v39 = vld [vmem:[%s4300_s6] ss:$0 sm:$0xff] }
 0x1d6   :  { %v2747_v47 = vpop.f32.mrb[19].mxu0  ;;  %v2787_v49 = vpop.f32.mrb[19].mxu1 }
 0x1d7   :  { %v3937_v50 = vadd.f32 %v2785_v44, %v2745_v43  ;;  %v2748_v51 = vadd.f32 %v2747_v47, %v2746_v45  ;;  %v2788_v52 = vadd.f32 %v2787_v49, %v2786_v46 }
 0x1d9   :  { %v3939_v53 = vadd.f32 %v2788_v52, %v2748_v51 }
 0x1db   :  { %v2749_v55 = vpop.f32.mrb[20].mxu0  ;;  %v2789_v56 = vpop.f32.mrb[20].mxu1 }
 0x1dc   :  { %v2750_v57 = vpop.f32.mrb[21].mxu0  ;;  %v2790_v58 = vpop.f32.mrb[21].mxu1 }
 0x1dd   :  { %v2751_v59 = vadd.f32 %v2750_v57, %v2749_v55  ;;  %v2791_v60 = vadd.f32 %v2790_v58, %v2789_v56  ;;  %v2752_v61 = vpop.f32.mrb[22].mxu0  ;;  %v2792_v62 = vpop.f32.mrb[22].mxu1  ;;  %v3429_v57 = vld [vmem:[%s4296_s0 + $0x10] sm:$0xff]   ;;  %v3430_v58 = vld [vmem:[%s4296_s0 + $0x18] sm:$0xff]  }
 0x1de   :  { %v2753_v63 = vpop.f32.mrb[23].mxu0  ;;  %v2793_v0 = vpop.f32.mrb[23].mxu1  ;;  %2936 = vmatprep.mubr.msk.bf16.mxu0 %vm912_vm2, %v3429_v57 }
 0x1df   :  { %v3941_v1 = vadd.f32 %v2791_v60, %v2751_v59  ;;  %v2754_v2 = vadd.f32 %v2753_v63, %v2752_v61  ;;  %v2794_v3 = vadd.f32 %v2793_v0, %v2792_v62  ;;  %2937 = vmatmul.mubr.msk.bf16.gmra.mrb[36].mxu0 %vm912_vm2, %v3430_v58  ;;  %v3982_v60 = vld [vmem:[%s4301_s8] ss:$0 sm:$0xff] }
 0x1e0   :  { %2986 = vmatprep.mubr.msk.f32.mxu0 %vm3500_vm3, %v3501_v20 }
 0x1e1   :  { %v3943_v4 = vadd.f32 %v2794_v3, %v2754_v2 }
 0x1e3   :  { %v2755_v5 = vpop.f32.mrb[24].mxu0  ;;  %v2795_v6 = vpop.f32.mrb[24].mxu1 }
 0x1e4   :  { %v2756_v7 = vpop.f32.mrb[25].mxu0  ;;  %v2796_v8 = vpop.f32.mrb[25].mxu1 }
 0x1e5   :  { %v2757_v12 = vadd.f32 %v2756_v7, %v2755_v5  ;;  %v2797_v13 = vadd.f32 %v2796_v8, %v2795_v6  ;;  %v2758_v14 = vpop.f32.mrb[26].mxu0  ;;  %v2798_v15 = vpop.f32.mrb[26].mxu1 }
 0x1e6   :  { %v2759_v16 = vpop.f32.mrb[27].mxu0  ;;  %v2799_v9 = vpop.f32.mrb[27].mxu1 }
 0x1e7   :  { %v3945_v17 = vadd.f32 %v2797_v13, %v2757_v12  ;;  %v2760_v22 = vadd.f32 %v2759_v16, %v2758_v14  ;;  %v2800_v23 = vadd.f32 %v2799_v9, %v2798_v15 }
 0x1e9   :  { %v3947_v24 = vadd.f32 %v2800_v23, %v2760_v22 }
 0x1eb   :  { %v2761_v25 = vpop.f32.mrb[28].mxu0  ;;  %v2801_v26 = vpop.f32.mrb[28].mxu1 }
 0x1ec   :  { %v2762_v27 = vpop.f32.mrb[29].mxu0  ;;  %v2802_v18 = vpop.f32.mrb[29].mxu1 }
 0x1ed   :  { %v2763_v28 = vadd.f32 %v2762_v27, %v2761_v25  ;;  %v2803_v19 = vadd.f32 %v2802_v18, %v2801_v26  ;;  %v2764_v21 = vpop.f32.mrb[30].mxu0  ;;  %v2804_v30 = vpop.f32.mrb[30].mxu1 }
 0x1ee   :  { %v2765_v31 = vpop.f32.mrb[31].mxu0  ;;  %v2805_v32 = vpop.f32.mrb[31].mxu1 }
 0x1ef   :  { %v3949_v33 = vadd.f32 %v2803_v19, %v2763_v28  ;;  %v2766_v34 = vadd.f32 %v2765_v31, %v2764_v21  ;;  %v2806_v36 = vadd.f32 %v2805_v32, %v2804_v30 }
 0x1f1   :  { %v3951_v37 = vadd.f32 %v2806_v36, %v2766_v34 }
 0x1f3   :  { %v2934_v40 = vpop.f32.mrb[32].mxu0  ;;  %v1098_v41 = vpop.f32.mrb[32].mxu1 }
 0x1f4   :  { %v972_v42 = vadd.f32 %v2934_v40, %v2692_v39  ;;  %v963_v43 = vpop.f32.mrb[33].mxu0  ;;  %v2958_v44 = vpop.f32.mrb[33].mxu1  ;;  %1106 = vrot.lane.b32.xlu0 %v1098_v41, %s3502_s25 }
 0x1f5   :  { %v964_v45 = vadd.f32 %v2692_v39, %v963_v43  ;;  %v2935_v46 = vpop.f32.mrb[34].mxu0 }
 0x1f6   :  { %997 = vst.msk [vmem:[#allocation2 + $0x10] sm:$0xff] %vm994_vm0, %v972_v42  ;;  %v975_v47 = vadd.f32 %v2935_v46, %v2692_v39  ;;  %v966_v49 = vpop.f32.mrb[35].mxu0 }
 0x1f7   :  { %995 = vst.msk [vmem:[#allocation2] sm:$0xff] %vm994_vm0, %v964_v45  ;;  %v967_v51 = vadd.f32 %v2692_v39, %v966_v49 }
 0x1f8   :  { %998 = vst.msk [vmem:[#allocation2 + $0x18] sm:$0xff] %vm994_vm0, %v975_v47 }
 0x1f9   :  { %996 = vst.msk [vmem:[#allocation2 + $0x8] sm:$0xff] %vm994_vm0, %v967_v51 }
 0x1fd   :  { %v1441_v42 = vld [vmem:[#allocation2 + $0x10] sm:$0xff] }
 0x1fe   :  { %v1102_v52 = vld [vmem:[#allocation2] sm:$0xff] }
 0x1ff   :  { %v1103_v55 = vadd.f32 %v1102_v52, %v1098_v41 }
 0x200   :  { %v1274_v25 = vld [vmem:[#allocation2 + $0x8] sm:$0xff] }
 0x201   :  { %3433 = vtanh.f32 %v1103_v55 }
 0x20b   :  { %v3434_v56 = vpop.eup %3433 }
 0x20c   :  { %1190 = vst.msk [vmem:[#allocation4] sm:$0xff] %vm994_vm0, %v3434_v56  ;;  %2968 = vmatmul.mubr.msk.f32.vlgmr.msra.gmra.mrb[34].mxu1 %vm994_vm0, %v3434_v56 }
 0x20d   :  { %3224 = vmatpush3.bf16.msra.mxu1 %v3923_v35  ;;  %2997 = vmatprep.mubr.msk.f32.mxu1 %vm3500_vm3, %v3501_v20 }
 0x20e   :  { %3225 = vmatprep.subr.bf16.mxu1 %v3499_v10 }
 0x211   :  { %3227 = vmatpush3.bf16.msra.mxu1 %v3933_v38 }
 0x212   :  { %3240 = vmatprep.subr.bf16.mxu1 %v3499_v10 }
 0x213   :  { %v1193_v16 = vld [vmem:[#allocation4] sm:$0xff] }
 0x266   :  { %v1107_v59 = vpop.permute.xlu0 %1106 }
 0x2b2   :  { %v2938_v5 = vpop.f32.mrb[36].mxu0 }
 0x2b3   :  { %v988_v6 = vadd.f32 %v2938_v5, %v2692_v39  ;;  %v979_v7 = vpop.f32.mrb[37].mxu0 }
 0x2b4   :  { %v980_v8 = vadd.f32 %v2692_v39, %v979_v7  ;;  %v2939_v12 = vpop.f32.mrb[38].mxu0 }
 0x2b5   :  { %1001 = vst.msk [vmem:[#allocation2 + $0x30] sm:$0xff] %vm994_vm0, %v988_v6  ;;  %v991_v13 = vadd.f32 %v2939_v12, %v2692_v39  ;;  %v982_v14 = vpop.f32.mrb[39].mxu0 }
 0x2b6   :  { %999 = vst.msk [vmem:[#allocation2 + $0x20] sm:$0xff] %vm994_vm0, %v980_v8  ;;  %v983_v15 = vadd.f32 %v2692_v39, %v982_v14 }
 0x2b7   :  { %1002 = vst.msk [vmem:[#allocation2 + $0x38] sm:$0xff] %vm994_vm0, %v991_v13 }
 0x2b8   :  { %1000 = vst.msk [vmem:[#allocation2 + $0x28] sm:$0xff] %vm994_vm0, %v983_v15 }
 0x2df   :  { %v1178_v61 = vpop.f32.mrb[34].mxu1 }
 0x2e0   :  { %v1179_v62 = vadd.f32 %v1178_v61, %v1107_v59  ;;  %v2969_v63 = vpop.f32.mrb[35].mxu1 }
 0x2e2   :  { %v1188_v0 = vadd.f32 %v3982_v60, %v1179_v62  ;;  %v1608_v62 = vld [vmem:[#allocation2 + $0x18] sm:$0xff] }
 0x2e4   :  { %3435 = vtanh.f32 %v1188_v0 }
 0x2ee   :  { %v3436_v2 = vpop.eup %3435 }
 0x2ef   :  { %1192 = vst.msk [vmem:[#allocation3] sm:$0xff] %vm994_vm0, %v3436_v2  ;;  %1191 = vst.msk [vmem:[#allocation5] sm:$0xff] %vm994_vm0, %v3436_v2 }
 0x2f6   :  { %v1194_v3 = vld [vmem:[#allocation5] sm:$0xff] }
 0x2f7   :  { %1196 = vrot.lane.b32.xlu1 %v1194_v3, %s3498_s21 }
 0x369   :  { %v1197_v9 = vpop.permute.xlu1 %1196 }
 0x36a   :  { %v1199_v22 = vsel %vm994_vm0, %v1193_v16, %v1197_v9 }
 0x36b   :  { %2987 = vmatmul.mubr.msk.f32.vlgmr.msra.gmra.mrb[40].mxu0 %vm1028_vm4, %v1199_v22  ;;  %v1775_v22 = vld [vmem:[#allocation2 + $0x20] sm:$0xff] }
 0x36c   :  { %3230 = vmatpush3.bf16.msra.mxu0 %v3835_v54  ;;  %3016 = vmatprep.mubr.msk.f32.mxu0 %vm3500_vm3, %v3501_v20 }
 0x36d   :  { %3231 = vmatprep.subr.bf16.mxu0 %v3499_v10 }
 0x370   :  { %3233 = vmatpush3.bf16.msra.mxu0 %v3853_v11 }
 0x371   :  { %3234 = vmatprep.subr.bf16.mxu0 %v3499_v10 }
 0x374   :  { %3236 = vmatpush3.bf16.msra.mxu0 %v3864_v29 }
 0x375   :  { %3237 = vmatprep.subr.bf16.mxu0 %v3499_v10 }
 0x378   :  { %3239 = vmatpush3.bf16.msra.mxu0 %v3882_v48 }
 0x379   :  { %3264 = vmatprep.subr.bf16.mxu0 %v3499_v10 }
 0x43e   :  { %v1269_v23 = vpop.f32.mrb[40].mxu0 }
 0x43f   :  { %v1275_v26 = vadd.f32 %v1274_v25, %v1269_v23  ;;  %1278 = vrot.lane.b32.xlu1 %v1269_v23, %s3502_s25  ;;  %v2988_v27 = vpop.f32.mrb[41].mxu0 }
 0x441   :  { %3437 = vtanh.f32 %v1275_v26 }
 0x44b   :  { %v3438_v18 = vpop.eup %3437 }
 0x44c   :  { %1356 = vst.msk [vmem:[#allocation4] sm:$0xff] %vm994_vm0, %v3438_v18  ;;  %2998 = vmatmul.mubr.msk.f32.vlgmr.msra.gmra.mrb[36].mxu1 %vm994_vm0, %v3438_v18 }
 0x44d   :  { %3242 = vmatpush3.bf16.msra.mxu1 %v3923_v35  ;;  %3027 = vmatprep.mubr.msk.f32.mxu1 %vm3500_vm3, %v3501_v20 }
 0x44e   :  { %3243 = vmatprep.subr.bf16.mxu1 %v3499_v10 }
 0x451   :  { %3245 = vmatpush3.bf16.msra.mxu1 %v3933_v38 }
 0x452   :  { %3246 = vmatprep.subr.bf16.mxu1 %v3499_v10 }
 0x453   :  { %v1360_v36 = vld [vmem:[#allocation4] sm:$0xff] }
 0x4b1   :  { %v1279_v28 = vpop.permute.xlu1 %1278 }
 0x51f   :  { %v1350_v19 = vpop.f32.mrb[36].mxu1 }
 0x520   :  { %v1351_v21 = vadd.f32 %v1350_v19, %v1279_v28  ;;  %v2999_v30 = vpop.f32.mrb[37].mxu1 }
 0x522   :  { %v1354_v31 = vadd.f32 %v3982_v60, %v1351_v21 }
 0x524   :  { %3439 = vtanh.f32 %v1354_v31 }
 0x52e   :  { %v3440_v32 = vpop.eup %3439 }
 0x52f   :  { %1359 = vst.msk [vmem:[#allocation3 + $0x8] sm:$0xff] %vm994_vm0, %v3440_v32  ;;  %1357 = vst.msk [vmem:[#allocation5] sm:$0xff] %vm994_vm0, %v3440_v32 }
 0x536   :  { %v1361_v34 = vld [vmem:[#allocation5] sm:$0xff] }
 0x537   :  { %1363 = vrot.lane.b32.xlu0 %v1361_v34, %s3498_s21 }
 0x5a9   :  { %v1364_v39 = vpop.permute.xlu0 %1363 }
 0x5aa   :  { %v1366_v40 = vsel %vm994_vm0, %v1360_v36, %v1364_v39 }
 0x5ab   :  { %3017 = vmatmul.mubr.msk.f32.vlgmr.msra.gmra.mrb[42].mxu0 %vm1028_vm4, %v1366_v40  ;;  %v1942_v40 = vld [vmem:[#allocation2 + $0x28] sm:$0xff] }
 0x5ac   :  { %3266 = vmatpush3.bf16.msra.mxu0 %v3835_v54  ;;  %3076 = vmatprep.mubr.msk.f32.mxu0 %vm3500_vm3, %v3501_v20 }
 0x5ad   :  { %3267 = vmatprep.subr.bf16.mxu0 %v3499_v10 }
 0x5b0   :  { %3269 = vmatpush3.bf16.msra.mxu0 %v3853_v11 }
 0x5b1   :  { %3270 = vmatprep.subr.bf16.mxu0 %v3499_v10 }
 0x5b4   :  { %3272 = vmatpush3.bf16.msra.mxu0 %v3864_v29 }
 0x5b5   :  { %3273 = vmatprep.subr.bf16.mxu0 %v3499_v10 }
 0x5b8   :  { %3275 = vmatpush3.bf16.msra.mxu0 %v3882_v48 }
 0x5b9   :  { %3294 = vmatprep.subr.bf16.mxu0 %v3499_v10 }
 0x67e   :  { %v1436_v41 = vpop.f32.mrb[42].mxu0 }
 0x67f   :  { %v1442_v43 = vadd.f32 %v1441_v42, %v1436_v41  ;;  %1445 = vrot.lane.b32.xlu1 %v1436_v41, %s3502_s25  ;;  %v3018_v44 = vpop.f32.mrb[43].mxu0 }
 0x681   :  { %3441 = vtanh.f32 %v1442_v43 }
 0x68b   :  { %v3442_v45 = vpop.eup %3441 }
 0x68c   :  { %1523 = vst.msk [vmem:[#allocation4] sm:$0xff] %vm994_vm0, %v3442_v45  ;;  %3028 = vmatmul.mubr.msk.f32.vlgmr.msra.gmra.mrb[38].mxu1 %vm994_vm0, %v3442_v45 }
 0x68d   :  { %3248 = vmatpush3.bf16.msra.mxu1 %v3835_v54  ;;  %3046 = vmatprep.mubr.msk.f32.mxu1 %vm3500_vm3, %v3501_v20 }
 0x68e   :  { %3249 = vmatprep.subr.bf16.mxu1 %v3499_v10 }
 0x691   :  { %3251 = vmatpush3.bf16.msra.mxu1 %v3853_v11 }
 0x692   :  { %3252 = vmatprep.subr.bf16.mxu1 %v3499_v10 }
 0x693   :  { %v1527_v57 = vld [vmem:[#allocation4] sm:$0xff] }
 0x695   :  { %3254 = vmatpush3.bf16.msra.mxu1 %v3864_v29 }
 0x696   :  { %3255 = vmatprep.subr.bf16.mxu1 %v3499_v10 }
 0x699   :  { %3257 = vmatpush3.bf16.msra.mxu1 %v3882_v48 }
 0x69a   :  { %3258 = vmatprep.subr.bf16.mxu1 %v3499_v10 }
 0x6f1   :  { %v1446_v46 = vpop.permute.xlu1 %1445 }
 0x75f   :  { %v1517_v47 = vpop.f32.mrb[38].mxu1 }
 0x760   :  { %v1518_v49 = vadd.f32 %v1517_v47, %v1446_v46  ;;  %v3029_v51 = vpop.f32.mrb[39].mxu1 }
 0x762   :  { %v1521_v52 = vadd.f32 %v3982_v60, %v1518_v49 }
 0x764   :  { %3443 = vtanh.f32 %v1521_v52 }
 0x76e   :  { %v3444_v55 = vpop.eup %3443 }
 0x76f   :  { %1526 = vst.msk [vmem:[#allocation3 + $0x10] sm:$0xff] %vm994_vm0, %v3444_v55  ;;  %1524 = vst.msk [vmem:[#allocation5] sm:$0xff] %vm994_vm0, %v3444_v55 }
 0x776   :  { %v1528_v56 = vld [vmem:[#allocation5] sm:$0xff] }
 0x777   :  { %1530 = vrot.lane.b32.xlu0 %v1528_v56, %s3498_s21 }
 0x7e9   :  { %v1531_v58 = vpop.permute.xlu0 %1530 }
 0x7ea   :  { %v1533_v59 = vsel %vm994_vm0, %v1527_v57, %v1531_v58 }
 0x7eb   :  { %3047 = vmatmul.mubr.msk.f32.vlgmr.msra.gmra.mrb[40].mxu1 %vm1028_vm4, %v1533_v59  ;;  %v2109_v59 = vld [vmem:[#allocation2 + $0x30] sm:$0xff] }
 0x7ec   :  { %3260 = vmatpush3.bf16.msra.mxu1 %v3923_v35  ;;  %3057 = vmatprep.mubr.msk.f32.mxu1 %vm3500_vm3, %v3501_v20 }
 0x7ed   :  { %3261 = vmatprep.subr.bf16.mxu1 %v3499_v10 }
 0x7f0   :  { %3263 = vmatpush3.bf16.msra.mxu1 %v3933_v38 }
 0x7f1   :  { %3276 = vmatprep.subr.bf16.mxu1 %v3499_v10 }
 0x8be   :  { %v1603_v61 = vpop.f32.mrb[40].mxu1 }
 0x8bf   :  { %v1609_v63 = vadd.f32 %v1608_v62, %v1603_v61  ;;  %1612 = vrot.lane.b32.xlu1 %v1603_v61, %s3502_s25  ;;  %v3048_v0 = vpop.f32.mrb[41].mxu1 }
 0x8c1   :  { %3445 = vtanh.f32 %v1609_v63 }
 0x8cb   :  { %v3446_v2 = vpop.eup %3445 }
 0x8cc   :  { %1690 = vst.msk [vmem:[#allocation4] sm:$0xff] %vm994_vm0, %v3446_v2  ;;  %3058 = vmatmul.mubr.msk.f32.vlgmr.msra.gmra.mrb[42].mxu1 %vm994_vm0, %v3446_v2 }
 0x8cd   :  { %3278 = vmatpush3.bf16.msra.mxu1 %v3923_v35  ;;  %3087 = vmatprep.mubr.msk.f32.mxu1 %vm3500_vm3, %v3501_v20 }
 0x8ce   :  { %3279 = vmatprep.subr.bf16.mxu1 %v3499_v10 }
 0x8d1   :  { %3281 = vmatpush3.bf16.msra.mxu1 %v3933_v38 }
 0x8d2   :  { %3282 = vmatprep.subr.bf16.mxu1 %v3499_v10 }
 0x8d3   :  { %v1694_v14 = vld [vmem:[#allocation4] sm:$0xff] }
 0x931   :  { %v1613_v3 = vpop.permute.xlu1 %1612 }
 0x99f   :  { %v1684_v5 = vpop.f32.mrb[42].mxu1 }
 0x9a0   :  { %v1685_v6 = vadd.f32 %v1684_v5, %v1613_v3  ;;  %v3059_v7 = vpop.f32.mrb[43].mxu1 }
 0x9a2   :  { %v1688_v8 = vadd.f32 %v3982_v60, %v1685_v6  ;;  %v2276_v6 = vld [vmem:[#allocation2 + $0x38] sm:$0xff] }
 0x9a4   :  { %3447 = vtanh.f32 %v1688_v8 }
 0x9ae   :  { %v3448_v12 = vpop.eup %3447 }
 0x9af   :  { %1693 = vst.msk [vmem:[#allocation3 + $0x18] sm:$0xff] %vm994_vm0, %v3448_v12  ;;  %1691 = vst.msk [vmem:[#allocation5] sm:$0xff] %vm994_vm0, %v3448_v12  ;;  %v2368_v12 = vld [vmem:[#allocation3 + $0x8] sm:$0xff] }
 0x9b6   :  { %v1695_v13 = vld [vmem:[#allocation5] sm:$0xff] }
 0x9b7   :  { %1697 = vrot.lane.b32.xlu0 %v1695_v13, %s3498_s21  ;;  %v2367_v13 = vld [vmem:[#allocation3] sm:$0xff] }
 0xa29   :  { %v1698_v15 = vpop.permute.xlu0 %1697 }
 0xa2a   :  { %v1700_v16 = vsel %vm994_vm0, %v1694_v14, %v1698_v15  ;;  %v3432_v14 = vld [vmem:[%s4302_s9 + $0x8] sm:$0xff]  }
 0xa2b   :  { %3077 = vmatmul.mubr.msk.f32.vlgmr.msra.gmra.mrb[44].mxu0 %vm1028_vm4, %v1700_v16  ;;  %v2375_v16 = vpack.c.bf16 %v2368_v12, %v2367_v13 }
 0xa2c   :  { %3296 = vmatpush3.bf16.msra.mxu0 %v3923_v35  ;;  %3117 = vmatprep.mubr.msk.f32.mxu0 %vm3500_vm3, %v3501_v20 }
 0xa2d   :  { %3297 = vmatprep.subr.bf16.mxu0 %v3499_v10 }
 0xa30   :  { %3299 = vmatpush3.bf16.msra.mxu0 %v3933_v38 }
 0xa31   :  { %3300 = vmatprep.subr.bf16.mxu0 %v3499_v10 }
 0xafe   :  { %v1770_v9 = vpop.f32.mrb[44].mxu0 }
 0xaff   :  { %v1776_v23 = vadd.f32 %v1775_v22, %v1770_v9  ;;  %1779 = vrot.lane.b32.xlu1 %v1770_v9, %s3502_s25  ;;  %v3078_v25 = vpop.f32.mrb[45].mxu0  ;;  %v2370_v9 = vld [vmem:[#allocation3 + $0x18] sm:$0xff] }
 0xb01   :  { %3449 = vtanh.f32 %v1776_v23  ;;  %v2369_v23 = vld [vmem:[#allocation3 + $0x10] sm:$0xff] }
 0xb02   :  { %v2376_v25 = vpack.c.bf16 %v2370_v9, %v2369_v23  ;;  %v2493_v9 = vld [vmem:[%s4305_s2 + $0x30] sm:$0xff] }
 0xb03   :  { %vm2501_vm12 = vcmp.eq.f32.partialorder %v2493_v9, 0.0 }
 0xb0b   :  { %v3450_v26 = vpop.eup %3449 }
 0xb0c   :  { %1857 = vst.msk [vmem:[#allocation4] sm:$0xff] %vm994_vm0, %v3450_v26  ;;  %3088 = vmatmul.mubr.msk.f32.vlgmr.msra.gmra.mrb[44].mxu1 %vm994_vm0, %v3450_v26 }
 0xb0d   :  { %3284 = vmatpush3.bf16.msra.mxu1 %v3835_v54  ;;  %3106 = vmatprep.mubr.msk.f32.mxu1 %vm3500_vm3, %v3501_v20 }
 0xb0e   :  { %3285 = vmatprep.subr.bf16.mxu1 %v3499_v10 }
 0xb11   :  { %3287 = vmatpush3.bf16.msra.mxu1 %v3853_v11 }
 0xb12   :  { %3288 = vmatprep.subr.bf16.mxu1 %v3499_v10 }
 0xb13   :  { %v1861_v32 = vld [vmem:[#allocation4] sm:$0xff] }
 0xb15   :  { %3290 = vmatpush3.bf16.msra.mxu1 %v3864_v29 }
 0xb16   :  { %3291 = vmatprep.subr.bf16.mxu1 %v3499_v10 }
 0xb19   :  { %3293 = vmatpush3.bf16.msra.mxu1 %v3882_v48 }
 0xb1a   :  { %3312 = vmatprep.subr.bf16.mxu1 %v3499_v10 }
 0xb71   :  { %v1780_v27 = vpop.permute.xlu1 %1779 }
 0xbdf   :  { %v1851_v18 = vpop.f32.mrb[44].mxu1 }
 0xbe0   :  { %v1852_v28 = vadd.f32 %v1851_v18, %v1780_v27  ;;  %v3089_v19 = vpop.f32.mrb[45].mxu1 }
 0xbe2   :  { %v1855_v21 = vadd.f32 %v3982_v60, %v1852_v28 }
 0xbe4   :  { %3451 = vtanh.f32 %v1855_v21 }
 0xbee   :  { %v3452_v30 = vpop.eup %3451 }
 0xbef   :  { %1860 = vst.msk [vmem:[#allocation3 + $0x20] sm:$0xff] %vm994_vm0, %v3452_v30  ;;  %1858 = vst.msk [vmem:[#allocation5] sm:$0xff] %vm994_vm0, %v3452_v30 }
 0xbf6   :  { %v1862_v31 = vld [vmem:[#allocation5] sm:$0xff]  ;;  %v2371_v26 = vld [vmem:[#allocation3 + $0x20] sm:$0xff] }
 0xbf7   :  { %1864 = vrot.lane.b32.xlu0 %v1862_v31, %s3498_s21 }
 0xc69   :  { %v1865_v34 = vpop.permute.xlu0 %1864 }
 0xc6a   :  { %v1867_v36 = vsel %vm994_vm0, %v1861_v32, %v1865_v34  ;;  %v4162_v32 = vld [vmem:[%s4304_s10] ss:$0 sm:$0xff]  ;;  %v2489_v34 = vld [vmem:[%s4305_s2 + $0x10] sm:$0xff] }
 0xc6b   :  { %3107 = vmatmul.mubr.msk.f32.vlgmr.msra.gmra.mrb[46].mxu1 %vm1028_vm4, %v1867_v36  ;;  %vm2497_vm5 = vcmp.eq.f32.partialorder %v2489_v34, 0.0 }
 0xc6c   :  { %3314 = vmatpush3.bf16.msra.mxu1 %v3923_v35  ;;  %3147 = vmatprep.mubr.msk.f32.mxu1 %vm3500_vm3, %v3501_v20 }
 0xc6d   :  { %3315 = vmatprep.subr.bf16.mxu1 %v3499_v10 }
 0xc70   :  { %3317 = vmatpush3.bf16.msra.mxu1 %v3933_v38 }
 0xc71   :  { %3318 = vmatprep.subr.bf16.mxu1 %v3499_v10 }
 0xd3e   :  { %v1937_v39 = vpop.f32.mrb[46].mxu1 }
 0xd3f   :  { %v1943_v41 = vadd.f32 %v1942_v40, %v1937_v39  ;;  %1946 = vrot.lane.b32.xlu1 %v1937_v39, %s3502_s25  ;;  %v3108_v42 = vpop.f32.mrb[47].mxu1 }
 0xd41   :  { %3453 = vtanh.f32 %v1943_v41  ;;  %v2487_v41 = vld [vmem:[%s4305_s2] sm:$0xff] }
 0xd42   :  { %vm2495_vm7 = vcmp.eq.f32.partialorder %v2487_v41, 0.0 }
 0xd4b   :  { %v3454_v43 = vpop.eup %3453 }
 0xd4c   :  { %2024 = vst.msk [vmem:[#allocation4] sm:$0xff] %vm994_vm0, %v3454_v43  ;;  %3118 = vmatmul.mubr.msk.f32.vlgmr.msra.gmra.mrb[46].mxu0 %vm994_vm0, %v3454_v43  ;;  %v2488_v43 = vld [vmem:[%s4305_s2 + $0x8] sm:$0xff] }
 0xd4d   :  { %3302 = vmatpush3.bf16.msra.mxu0 %v3835_v54  ;;  %3136 = vmatprep.mubr.msk.f32.mxu0 %vm3500_vm3, %v3501_v20  ;;  %vm2496_vm8 = vcmp.eq.f32.partialorder %v2488_v43, 0.0 }
 0xd4e   :  { %3303 = vmatprep.subr.bf16.mxu0 %v3499_v10 }
 0xd51   :  { %3305 = vmatpush3.bf16.msra.mxu0 %v3853_v11 }
 0xd52   :  { %3306 = vmatprep.subr.bf16.mxu0 %v3499_v10 }
 0xd53   :  { %v2028_v55 = vld [vmem:[#allocation4] sm:$0xff] }
 0xd55   :  { %3308 = vmatpush3.bf16.msra.mxu0 %v3864_v29 }
 0xd56   :  { %3309 = vmatprep.subr.bf16.mxu0 %v3499_v10 }
 0xd59   :  { %3311 = vmatpush3.bf16.msra.mxu0 %v3882_v48 }
 0xd5a   :  { %3330 = vmatprep.subr.bf16.mxu0 %v3499_v10 }
 0xdb1   :  { %v1947_v44 = vpop.permute.xlu1 %1946 }
 0xe1f   :  { %v2018_v45 = vpop.f32.mrb[46].mxu0 }
 0xe20   :  { %v2019_v46 = vadd.f32 %v2018_v45, %v1947_v44  ;;  %v3119_v47 = vpop.f32.mrb[47].mxu0 }
 0xe22   :  { %v2022_v49 = vadd.f32 %v3982_v60, %v2019_v46 }
 0xe24   :  { %3455 = vtanh.f32 %v2022_v49 }
 0xe2e   :  { %v3456_v51 = vpop.eup %3455 }
 0xe2f   :  { %2027 = vst.msk [vmem:[#allocation3 + $0x28] sm:$0xff] %vm994_vm0, %v3456_v51  ;;  %2025 = vst.msk [vmem:[#allocation5] sm:$0xff] %vm994_vm0, %v3456_v51 }
 0xe36   :  { %v2029_v52 = vld [vmem:[#allocation5] sm:$0xff] }
 0xe37   :  { %2031 = vrot.lane.b32.xlu0 %v2029_v52, %s3498_s21  ;;  %v2372_v22 = vld [vmem:[#allocation3 + $0x28] sm:$0xff] }
 0xe38   :  { %v2377_v18 = vpack.c.bf16 %v2372_v22, %v2371_v26 }
 0xea9   :  { %v2032_v56 = vpop.permute.xlu0 %2031 }
 0xeaa   :  { %v2034_v57 = vsel %vm994_vm0, %v2028_v55, %v2032_v56  ;;  %v2490_v55 = vld [vmem:[%s4305_s2 + $0x18] sm:$0xff] }
 0xeab   :  { %3137 = vmatmul.mubr.msk.f32.vlgmr.msra.gmra.mrb[48].mxu0 %vm1028_vm4, %v2034_v57  ;;  %vm2498_vm9 = vcmp.eq.f32.partialorder %v2490_v55, 0.0 }
 0xeac   :  { %3332 = vmatpush3.bf16.msra.mxu0 %v3923_v35  ;;  %3177 = vmatprep.mubr.msk.f32.mxu0 %vm3500_vm3, %v3501_v20 }
 0xead   :  { %3333 = vmatprep.subr.bf16.mxu0 %v3499_v10 }
 0xeb0   :  { %3335 = vmatpush3.bf16.msra.mxu0 %v3933_v38 }
 0xf7e   :  { %v2104_v58 = vpop.f32.mrb[48].mxu0 }
 0xf7f   :  { %v2110_v61 = vadd.f32 %v2109_v59, %v2104_v58  ;;  %2113 = vrot.lane.b32.xlu1 %v2104_v58, %s3502_s25  ;;  %v3138_v62 = vpop.f32.mrb[49].mxu0 }
 0xf81   :  { %3457 = vtanh.f32 %v2110_v61 }
 0xf8b   :  { %v3458_v63 = vpop.eup %3457 }
 0xf8c   :  { %2191 = vst.msk [vmem:[#allocation4] sm:$0xff] %vm994_vm0, %v3458_v63  ;;  %3148 = vmatmul.mubr.msk.f32.vlgmr.msra.gmra.mrb[48].mxu1 %vm994_vm0, %v3458_v63 }
 0xf8d   :  { %3320 = vmatpush3.bf16.msra.mxu1 %v3835_v54  ;;  %3166 = vmatprep.mubr.msk.f32.mxu1 %vm3500_vm3, %v3501_v20 }
 0xf8e   :  { %3321 = vmatprep.subr.bf16.mxu1 %v3499_v10 }
 0xf91   :  { %3323 = vmatpush3.bf16.msra.mxu1 %v3853_v11 }
 0xf92   :  { %3324 = vmatprep.subr.bf16.mxu1 %v3499_v10 }
 0xf95   :  { %3326 = vmatpush3.bf16.msra.mxu1 %v3864_v29  ;;  %v2195_v29 = vld [vmem:[#allocation4] sm:$0xff] }
 0xf96   :  { %3327 = vmatprep.subr.bf16.mxu1 %v3499_v10 }
 0xf99   :  { %3329 = vmatpush3.bf16.msra.mxu1 %v3882_v48  ;;  %v3431_v48 = vld [vmem:[%s4302_s9] sm:$0xff]  }
 0xf9a   :  { %3180 = vmatprep.subr.bf16.mxu0 %v3431_v48 }
 0xff1   :  { %v2114_v35 = vpop.permute.xlu1 %2113 }
0x105f   :  { %v2185_v38 = vpop.f32.mrb[48].mxu1 }
0x1060   :  { %v2186_v0 = vadd.f32 %v2185_v38, %v2114_v35  ;;  %v3149_v2 = vpop.f32.mrb[49].mxu1 }
0x1062   :  { %v2189_v54 = vadd.f32 %v3982_v60, %v2186_v0 }
0x1064   :  { %3459 = vtanh.f32 %v2189_v54 }
0x106e   :  { %v3460_v20 = vpop.eup %3459 }
0x106f   :  { %2194 = vst.msk [vmem:[#allocation3 + $0x30] sm:$0xff] %vm994_vm0, %v3460_v20  ;;  %2192 = vst.msk [vmem:[#allocation5] sm:$0xff] %vm994_vm0, %v3460_v20 }
0x1076   :  { %v2196_v11 = vld [vmem:[#allocation5] sm:$0xff]  ;;  %v2373_v63 = vld [vmem:[#allocation3 + $0x30] sm:$0xff] }
0x1077   :  { %2198 = vrot.lane.b32.xlu0 %v2196_v11, %s3498_s21 }
0x10e9   :  { %v2199_v3 = vpop.permute.xlu0 %2198 }
0x10ea   :  { %v2201_v10 = vsel %vm994_vm0, %v2195_v29, %v2199_v3 }
0x10eb   :  { %3167 = vmatmul.mubr.msk.f32.vlgmr.msra.gmra.mrb[50].mxu1 %vm1028_vm4, %v2201_v10 }
0x11be   :  { %v2271_v5 = vpop.f32.mrb[50].mxu1 }
0x11bf   :  { %v2277_v7 = vadd.f32 %v2276_v6, %v2271_v5  ;;  %2280 = vrot.lane.b32.xlu1 %v2271_v5, %s3502_s25  ;;  %v3168_v8 = vpop.f32.mrb[51].mxu1 }
0x11c1   :  { %3461 = vtanh.f32 %v2277_v7  ;;  %v2491_v7 = vld [vmem:[%s4305_s2 + $0x20] sm:$0xff] }
0x11c2   :  { %vm2499_vm10 = vcmp.eq.f32.partialorder %v2491_v7, 0.0 }
0x11cb   :  { %v3462_v15 = vpop.eup %3461 }
0x11cc   :  { %2358 = vst.msk [vmem:[#allocation4] sm:$0xff] %vm994_vm0, %v3462_v15  ;;  %3178 = vmatmul.mubr.msk.f32.vlgmr.msra.gmra.mrb[50].mxu0 %vm994_vm0, %v3462_v15 }
0x11cd   :  { %3181 = vmatpush3.bf16.msra.mxu0 %v3431_v48  ;;  %3184 = vmatprep.mubr.msk.bf16.mxu0 %vm994_vm0, %v2375_v16  ;;  %v2492_v16 = vld [vmem:[%s4305_s2 + $0x28] sm:$0xff] }
0x11ce   :  { %3182 = vmatprep.subr.bf16.mxu0 %v3432_v14  ;;  %vm2500_vm11 = vcmp.eq.f32.partialorder %v2492_v16, 0.0 }
0x11d1   :  { %3183 = vmatpush3.bf16.msra.mxu0 %v3432_v14 }
0x11d3   :  { %v2362_v27 = vld [vmem:[#allocation4] sm:$0xff] }
0x11d4   :  { %2363 = vst.msk [vmem:[%s4303_s15] sm:$0xff] %vm994_vm0, %v2362_v27  ;;  %3185 = vmatmul.mubr.msk.bf16.vlgmr.msra.gmra.mrb[52].mxu0 %vm994_vm0, %v2376_v25 }
0x11d5   :  { %3188 = vmatprep.mubr.msk.bf16.mxu0 %vm994_vm0, %v2377_v18 }
0x1231   :  { %v2281_v28 = vpop.permute.xlu1 %2280 }
0x129f   :  { %v2352_v19 = vpop.f32.mrb[50].mxu0 }
0x12a0   :  { %v2353_v21 = vadd.f32 %v2352_v19, %v2281_v28  ;;  %v3179_v30 = vpop.f32.mrb[51].mxu0  ;;  %v2494_v28 = vld [vmem:[%s4305_s2 + $0x38] sm:$0xff] }
0x12a1   :  { %vm2502_vm13 = vcmp.eq.f32.partialorder %v2494_v28, 0.0 }
0x12a2   :  { %v2356_v31 = vadd.f32 %v3982_v60, %v2353_v21 }
0x12a4   :  { %3463 = vtanh.f32 %v2356_v31 }
0x12a7   :  { %v3186_v36 = vpop.f32.mrb[52].mxu0 }
0x12a8   :  { %v2457_v39 = vadd.f32 %v3186_v36, %v4162_v32  ;;  %v2448_v40 = vpop.f32.mrb[53].mxu0 }
0x12a9   :  { %v2449_v60 = vadd.f32 %v4162_v32, %v2448_v40  ;;  %v3187_v42 = vpop.f32.mrb[54].mxu0 }
0x12aa   :  { %v2481_v44 = vadd.f32 %v2457_v39, %v3941_v1  ;;  %v2460_v45 = vadd.f32 %v3187_v42, %v4162_v32  ;;  %v2451_v46 = vpop.f32.mrb[55].mxu0 }
0x12ab   :  { %v2479_v47 = vadd.f32 %v2449_v60, %v3937_v50  ;;  %v2452_v49 = vadd.f32 %v4162_v32, %v2451_v46 }
0x12ac   :  { %v2482_v51 = vadd.f32 %v2460_v45, %v3943_v4  ;;  %v2505_v52 = vsel %vm2497_vm5, %v2481_v44, %v2489_v34 }
0x12ad   :  { %v2480_v56 = vadd.f32 %v2452_v49, %v3939_v53  ;;  %v2518_v1 = vsel %vm2511_vm6, %v2505_v52, -inf  ;;  %v2503_v58 = vsel %vm2495_vm7, %v2479_v47, %v2487_v41 }
0x12ae   :  { %v3464_v57 = vpop.eup %3463  ;;  %2519 = vmax.xlane.f32.xlu0 %v2518_v1  ;;  %v2512_v59 = vsel %vm2511_vm6, %v2503_v58, -inf  ;;  %v2506_v61 = vsel %vm2498_vm9, %v2482_v51, %v2490_v55 }
0x12af   :  { %2359 = vst.msk [vmem:[#allocation5] sm:$0xff] %vm994_vm0, %v3464_v57  ;;  %2361 = vst.msk [vmem:[#allocation3 + $0x38] sm:$0xff] %vm994_vm0, %v3464_v57  ;;  %v2504_v50 = vsel %vm2496_vm8, %v2480_v56, %v2488_v43  ;;  %v2521_v53 = vsel %vm2511_vm6, %v2506_v61, -inf }
0x12b0   :  { %v2515_v4 = vsel %vm2511_vm6, %v2504_v50, -inf }
0x12b1   :  { %2516 = vmax.xlane.f32.xlu1 %v2515_v4 }
0x12b2   :  { %2513 = vmax.xlane.f32.xlu0 %v2512_v59 }
0x12b6   :  { %v2364_v62 = vld [vmem:[#allocation5] sm:$0xff]  ;;  %2522 = vmax.xlane.f32.xlu0 %v2521_v53  ;;  %v2374_v35 = vld [vmem:[#allocation3 + $0x38] sm:$0xff] }
0x12b7   :  { %2719 = vst.msk [vmem:[%s4303_s15 + $0x8] sm:$0xff] %vm994_vm0, %v2364_v62  ;;  %v2378_v38 = vpack.c.bf16 %v2374_v35, %v2373_v63 }
0x12b9   :  { %3189 = vmatmul.mubr.msk.bf16.gmra.mrb[56].mxu0 %vm994_vm0, %v2378_v38 }
0x133b   :  { %v2520_v0 = vpop.xlane.xlu0 %2519 }
0x133c   :  { %v4199_v3 = vsub.f32 %v2505_v52, %v2520_v0 }
0x133e   :  { %v2517_v54 = vpop.xlane.xlu1 %2516  ;;  %v2548_v13 = vmul.f32 1.442695, %v4199_v3 }
0x133f   :  { %v2514_v2 = vpop.xlane.xlu0 %2513  ;;  %v4197_v11 = vsub.f32 %v2504_v50, %v2517_v54 }
0x1340   :  { %v4195_v20 = vsub.f32 %v2503_v58, %v2514_v2 }
0x1341   :  { %v2546_v48 = vmul.f32 1.442695, %v4197_v11 }
0x1342   :  { %v2544_v10 = vmul.f32 1.442695, %v4195_v20 }
0x1343   :  { %v2523_v29 = vpop.xlane.xlu0 %2522 }
0x1344   :  { %v4203_v5 = vsub.f32 %v2506_v61, %v2523_v29  ;;  %3465 = vpow2.f32 %v2544_v10 }
0x1345   :  { %3467 = vpow2.f32 %v2546_v48 }
0x1346   :  { %v2550_v26 = vmul.f32 1.442695, %v4203_v5  ;;  %3469 = vpow2.f32 %v2548_v13 }
0x1348   :  { %3471 = vpow2.f32 %v2550_v26 }
0x138c   :  { %v3190_v6 = vpop.f32.mrb[56].mxu0 }
0x138d   :  { %v2473_v8 = vadd.f32 %v3190_v6, %v4162_v32  ;;  %v2464_v12 = vpop.f32.mrb[57].mxu0 }
0x138e   :  { %v2465_v14 = vadd.f32 %v4162_v32, %v2464_v12  ;;  %v3191_v15 = vpop.f32.mrb[58].mxu0 }
0x138f   :  { %v2485_v22 = vadd.f32 %v2473_v8, %v3949_v33  ;;  %v2476_v23 = vadd.f32 %v3191_v15, %v4162_v32  ;;  %v2467_v25 = vpop.f32.mrb[59].mxu0 }
0x1390   :  { %v2483_v27 = vadd.f32 %v2465_v14, %v3945_v17  ;;  %v2468_v18 = vadd.f32 %v4162_v32, %v2467_v25 }
0x1391   :  { %v2486_v19 = vadd.f32 %v2476_v23, %v3951_v37  ;;  %v2509_v31 = vsel %vm2501_vm12, %v2485_v22, %v2493_v9  ;;  %v3466_v37 = vpop.eup %3465 }
0x1392   :  { %v2484_v33 = vadd.f32 %v2468_v18, %v3947_v24  ;;  %v2507_v21 = vsel %vm2499_vm10, %v2483_v27, %v2491_v7  ;;  %v2530_v36 = vsel %vm2511_vm6, %v2509_v31, -inf  ;;  %v3468_v40 = vpop.eup %3467  ;;  %v2560_v24 = vsel %vm2511_vm6, %v3466_v37, 0.0 }
0x1393   :  { %v2524_v30 = vsel %vm2511_vm6, %v2507_v21, -inf  ;;  %v2510_v34 = vsel %vm2502_vm13, %v2486_v19, %v2494_v28  ;;  %v3470_v41 = vpop.eup %3469  ;;  %v2563_v60 = vsel %vm2511_vm6, %v3468_v40, 0.0 }
0x1394   :  { %2525 = vmax.xlane.f32.xlu1 %v2524_v30  ;;  %v2508_v17 = vsel %vm2500_vm11, %v2484_v33, %v2492_v16  ;;  %v2533_v39 = vsel %vm2511_vm6, %v2510_v34, -inf  ;;  %v3472_v42 = vpop.eup %3471  ;;  %v2566_v43 = vsel %vm2511_vm6, %v3470_v41, 0.0 }
0x1395   :  { %v2527_v32 = vsel %vm2511_vm6, %v2508_v17, -inf  ;;  %v2569_v44 = vsel %vm2511_vm6, %v3472_v42, 0.0 }
0x1396   :  { %2528 = vmax.xlane.f32.xlu0 %v2527_v32 }
0x1398   :  { %2531 = vmax.xlane.f32.xlu1 %v2530_v36 }
0x139a   :  { %2534 = vmax.xlane.f32.xlu0 %v2533_v39 }
0x139c   :  { %2561 = vadd.xlane.f32.xlu1 %v2560_v24 }
0x139e   :  { %2564 = vadd.xlane.f32.xlu0 %v2563_v60 }
0x13a0   :  { %2567 = vadd.xlane.f32.xlu1 %v2566_v43 }
0x13a2   :  { %2570 = vadd.xlane.f32.xlu0 %v2569_v44 }
0x1421   :  { %v2526_v45 = vpop.xlane.xlu1 %2525 }
0x1422   :  { %v4235_v46 = vsub.f32 %v2507_v21, %v2526_v45 }
0x1423   :  { %v2529_v47 = vpop.xlane.xlu0 %2528 }
0x1424   :  { %v2552_v49 = vmul.f32 1.442695, %v4235_v46  ;;  %v4238_v51 = vsub.f32 %v2508_v17, %v2529_v47 }
0x1425   :  { %v2532_v52 = vpop.xlane.xlu1 %2531 }
0x1426   :  { %3473 = vpow2.f32 %v2552_v49  ;;  %v2554_v55 = vmul.f32 1.442695, %v4238_v51  ;;  %v4241_v56 = vsub.f32 %v2509_v31, %v2532_v52 }
0x1427   :  { %v2535_v1 = vpop.xlane.xlu0 %2534 }
0x1428   :  { %3475 = vpow2.f32 %v2554_v55  ;;  %v2556_v57 = vmul.f32 1.442695, %v4241_v56  ;;  %v4244_v58 = vsub.f32 %v2510_v34, %v2535_v1 }
0x1429   :  { %v2562_v50 = vpop.xlane.xlu1 %2561 }
0x142a   :  { %3477 = vpow2.f32 %v2556_v57  ;;  %v2558_v4 = vmul.f32 1.442695, %v4244_v58 }
0x142b   :  { %3479 = vlog2.f32 %v2562_v50  ;;  %v2565_v59 = vpop.xlane.xlu0 %2564 }
0x142c   :  { %3481 = vpow2.f32 %v2558_v4 }
0x142d   :  { %3483 = vlog2.f32 %v2565_v59  ;;  %v2568_v61 = vpop.xlane.xlu1 %2567 }
0x142e   :  { %3485 = vlog2.f32 %v2568_v61 }
0x142f   :  { %v2571_v53 = vpop.xlane.xlu0 %2570 }
0x1430   :  { %v3474_v62 = vpop.eup %3473  ;;  %3487 = vlog2.f32 %v2571_v53 }
0x1431   :  { %v2572_v63 = vsel %vm2511_vm6, %v3474_v62, 0.0 }
0x1432   :  { %v3476_v35 = vpop.eup %3475  ;;  %2573 = vadd.xlane.f32.xlu1 %v2572_v63 }
0x1433   :  { %v2575_v38 = vsel %vm2511_vm6, %v3476_v35, 0.0 }
0x1434   :  { %v3478_v0 = vpop.eup %3477  ;;  %2576 = vadd.xlane.f32.xlu0 %v2575_v38 }
0x1435   :  { %v3480_v2 = vpop.eup %3479  ;;  %v2578_v54 = vsel %vm2511_vm6, %v3478_v0, 0.0 }
0x1436   :  { %v3482_v29 = vpop.eup %3481  ;;  %v2585_v10 = vmul.f32 0.6931472, %v3480_v2  ;;  %2579 = vadd.xlane.f32.xlu1 %v2578_v54 }
0x1437   :  { %v3484_v48 = vpop.eup %3483  ;;  %v2581_v6 = vsel %vm2511_vm6, %v3482_v29, 0.0 }
0x1438   :  { %v3486_v7 = vpop.eup %3485  ;;  %v2600_v8 = vsub.f32 %v4195_v20, %v2585_v10  ;;  %v2587_v12 = vmul.f32 0.6931472, %v3484_v48  ;;  %2582 = vadd.xlane.f32.xlu0 %v2581_v6 }
0x1439   :  { %v2589_v13 = vmul.f32 0.6931472, %v3486_v7 }
0x143a   :  { %v3488_v14 = vpop.eup %3487  ;;  %2608 = vst.msk [vmem:[%s4306_s14] sm:$0xff] %vm2511_vm6, %v2600_v8  ;;  %v2601_v15 = vsub.f32 %v4197_v11, %v2587_v12 }
0x143b   :  { %v2602_v16 = vsub.f32 %v4199_v3, %v2589_v13  ;;  %v2591_v9 = vmul.f32 0.6931472, %v3488_v14 }
0x143c   :  { %2609 = vst.msk [vmem:[%s4306_s14 + $0x8] sm:$0xff] %vm2511_vm6, %v2601_v15 }
0x143d   :  { %2610 = vst.msk [vmem:[%s4306_s14 + $0x10] sm:$0xff] %vm2511_vm6, %v2602_v16  ;;  %v2603_v20 = vsub.f32 %v4203_v5, %v2591_v9 }
0x143f   :  { %2611 = vst.msk [vmem:[%s4306_s14 + $0x18] sm:$0xff] %vm2511_vm6, %v2603_v20 }
0x14bf   :  { %v2574_v11 = vpop.xlane.xlu1 %2573 }
0x14c0   :  { %3489 = vlog2.f32 %v2574_v11 }
0x14c1   :  { %v2577_v3 = vpop.xlane.xlu0 %2576 }
0x14c2   :  { %3491 = vlog2.f32 %v2577_v3 }
0x14c3   :  { %v2580_v22 = vpop.xlane.xlu1 %2579 }
0x14c4   :  { %3493 = vlog2.f32 %v2580_v22 }
0x14c5   :  { %v2583_v23 = vpop.xlane.xlu0 %2582 }
0x14c6   :  { %3495 = vlog2.f32 %v2583_v23 }
0x14ca   :  { %v3490_v25 = vpop.eup %3489 }
0x14cb   :  { %v2593_v26 = vmul.f32 0.6931472, %v3490_v25 }
0x14cc   :  { %v3492_v27 = vpop.eup %3491 }
0x14cd   :  { %v2604_v18 = vsub.f32 %v4235_v46, %v2593_v26  ;;  %v2595_v28 = vmul.f32 0.6931472, %v3492_v27 }
0x14ce   :  { %v3494_v5 = vpop.eup %3493 }
0x14cf   :  { %2612 = vst.msk [vmem:[%s4306_s14 + $0x20] sm:$0xff] %vm2511_vm6, %v2604_v18  ;;  %v2605_v19 = vsub.f32 %v4238_v51, %v2595_v28  ;;  %v2597_v33 = vmul.f32 0.6931472, %v3494_v5 }
0x14d0   :  { %v3496_v21 = vpop.eup %3495 }
0x14d1   :  { %2613 = vst.msk [vmem:[%s4306_s14 + $0x28] sm:$0xff] %vm2511_vm6, %v2605_v19  ;;  %v2606_v30 = vsub.f32 %v4241_v56, %v2597_v33  ;;  %v2599_v17 = vmul.f32 0.6931472, %v3496_v21 }
0x14d3   :  { %2614 = vst.msk [vmem:[%s4306_s14 + $0x30] sm:$0xff] %vm2511_vm6, %v2606_v30  ;;  %v2607_v31 = vsub.f32 %v4244_v58, %v2599_v17 }
0x14d5   :  { %2615 = vst.msk [vmem:[%s4306_s14 + $0x38] sm:$0xff] %vm2511_vm6, %v2607_v31 }

</bundles_post_ra>
